<compile_context>
chip_gen: v6e
topology: v6e:2x2x1
jax: 0.10.0
libtpu: 0.0.40
codegen_flags: <defaults>
</compile_context>

<pallas_src>
import functools

import jax
import jax.numpy as jnp
from jax import lax
from jax.experimental import pallas as pl
from jax.experimental.pallas import tpu as pltpu


def _round_up(n, m):
    return ((n + m - 1) // m) * m


def _gate_stride(H):
    """Per-gate column stride used inside the kernel (== hidden width Hd)."""
    if H % 128 == 0:
        return H                       # already lane aligned
    if H < 128 and (4 * H) % 128 == 0:
        return H                       # unpadded 4H layout is lane aligned
    if H < 128:
        return H                       # small H: padding would inflate work 128/H x
    return _round_up(H, 128)           # large, misaligned H: pad per gate


# ---------------------------------------------------------------------------
# Fused kernel: all layers + output projection, time-chunked grid.
# ---------------------------------------------------------------------------
def _fused_lstm_kernel(L, chunk_T, Bp, Hg, T, Tp, *refs):
    # refs: x_chunk, (wihT, whhT, b)*L, out_wT, out_b, h0, c0   (inputs)
    #       out_chunk, hN, cN                                    (outputs)
    #       gx_scr, hs_scr                                       (scratch)
    x_ref = refs[0]
    lw = refs[1:1 + 3 * L]
    out_wT_ref, out_b_ref, h0_ref, c0_ref = refs[1 + 3 * L:5 + 3 * L]
    out_ref, hN_ref, cN_ref = refs[5 + 3 * L:8 + 3 * L]
    gx_scr, hs_scr = refs[8 + 3 * L:]

    chunk = pl.program_id(0)
    needs_mask = (Tp != T)                     # static: last chunk is ragged

    # Initialize the VMEM-resident (h, c) carries from the provided hiddens.
    @pl.when(chunk == 0)
    def _():
        hN_ref[...] = h0_ref[...]
        cN_ref[...] = c0_ref[...]

    for l in range(L):                          # static unroll over layers
        wihT_ref = lw[3 * l + 0]                # bf16 (rows, 4*Hg)
        whhT_ref = lw[3 * l + 1]                # bf16 (Hg, 4*Hg)
        b_ref = lw[3 * l + 2]                   # f32  (1, 4*Hg)

        # Hoisted input->gates matmul for every timestep in this chunk:
        # one bf16 MXU matmul (f32 accumulate) + bias into the gx slab.
        xin = x_ref[...].astype(jnp.bfloat16) if l == 0 else hs_scr[...]
        gx_scr[...] = (jnp.dot(xin, wihT_ref[...],
                               preferred_element_type=jnp.float32)
                       + b_ref[...])

        h0 = hN_ref[l]                          # f32 (Bp, Hg) carry
        c0 = cN_ref[l]

        def step(t, carry):
            h, c = carry
            row = pl.multiple_of(t * Bp, Bp)    # sublane-aligned offset
            gates = (gx_scr[pl.ds(row, Bp), :]
                     + jnp.dot(h.astype(jnp.bfloat16), whhT_ref[...],
                               preferred_element_type=jnp.float32))
            i_g = jax.nn.sigmoid(gates[:, 0 * Hg:1 * Hg])
            f_g = jax.nn.sigmoid(gates[:, 1 * Hg:2 * Hg])
            g_g = jnp.tanh(gates[:, 2 * Hg:3 * Hg])
            o_g = jax.nn.sigmoid(gates[:, 3 * Hg:4 * Hg])
            c_new = f_g * c + i_g * g_g
            h_new = o_g * jnp.tanh(c_new)
            if needs_mask:                      # keep carries frozen on padded steps
                valid = (chunk * chunk_T + t) < T
                h_new = jnp.where(valid, h_new, h)
                c_new = jnp.where(valid, c_new, c)
            hs_scr[pl.ds(row, Bp), :] = h_new.astype(hs_scr.dtype)
            return h_new, c_new

        # Capped partial unroll: scheduling visibility without vreg blow-up.
        h_T, c_T = lax.fori_loop(0, chunk_T, step, (h0, c0),
                                 unroll=min(4, chunk_T))

        hN_ref[l] = h_T                         # resident carry for next chunk
        cN_ref[l] = c_T
        # Inter-layer dropout is identity in eval mode.

    # Fused output head for this chunk: Dropout (eval identity) + Linear,
    # lane-dense (Op is a multiple of 128) store overlapped with next chunk.
    out_ref[...] = (jnp.dot(hs_scr[...], out_wT_ref[...],
                            preferred_element_type=jnp.float32)
                    + out_b_ref[...]).astype(out_ref.dtype)


# ---------------------------------------------------------------------------
# Wrapper: padding / layout plumbing + pallas_call.
# ---------------------------------------------------------------------------
@functools.partial(jax.jit,
                   static_argnames=("hidden_dim", "output_dim", "time_chunk"))
def rnn_forward(x, layer_params, out_wT, out_b, h0, c0, *,
                hidden_dim, output_dim, time_chunk=None):
    """
    x:            (B, T, input_dim), batch-first (PyTorch batch_first=True)
    layer_params: tuple of (wihT_bf16, whhT_bf16, bias_f32) per layer
    out_wT:       (Hg, Op) bf16;  out_b: (1, Op) f32   (Op = round_up(O,128))
    h0, c0:       (num_layers, B, hidden_dim)
    returns:      output (B, T, output_dim), (h_n, c_n)
    """
    B, T, In = x.shape
    L = len(layer_params)
    Hg = layer_params[0][1].shape[0]           # whhT is (Hg, 4*Hg)
    In_pad = layer_params[0][0].shape[0]       # layer-0 wihT rows (padded)
    Op = out_wT.shape[-1]                      # lane-padded output width
    Bp = _round_up(B, 8)

    if time_chunk is None:
        time_chunk = max(1, 512 // Bp)         # ~512 MXU rows per chunk
    chunk_T = max(1, min(time_chunk, T))
    n_chunks = pl.cdiv(T, chunk_T)
    Tp = n_chunks * chunk_T
    CR = chunk_T * Bp                          # rows per chunk

    # Time-major, batch/time/feature padded, flattened to (Tp*Bp, In_pad).
    x_tm = jnp.transpose(x, (1, 0, 2)).astype(jnp.float32)
    x_p = jnp.zeros((Tp, Bp, In_pad), jnp.float32).at[:T, :B, :In].set(x_tm)
    x2d = x_p.reshape(Tp * Bp, In_pad)

    h0_p = jnp.zeros((L, Bp, Hg), jnp.float32).at[:, :B, :hidden_dim].set(
        h0.astype(jnp.float32))
    c0_p = jnp.zeros((L, Bp, Hg), jnp.float32).at[:, :B, :hidden_dim].set(
        c0.astype(jnp.float32))

    flat_w = [w for lp in layer_params for w in lp]

    # Explicit scoped-VMEM budget: chunk slabs + weights + carries, ~40% headroom.
    est = 2 * CR * In_pad * 4 + 2 * CR * Op * 4
    for w in list(flat_w) + [out_wT, out_b]:
        est += 2 * w.size * jnp.dtype(w.dtype).itemsize
    est += 4 * 2 * L * Bp * max(Hg, 128) * 4            # h0,c0,hN,cN (lane padded)
    est += CR * 4 * Hg * 4 + CR * Hg * 2                # gx (f32) + hs (bf16) scratch
    vmem_limit = int(min(100 << 20, max(int(est * 1.4) + (4 << 20), 32 << 20)))

    out2d, hN, cN = pl.pallas_call(
        functools.partial(_fused_lstm_kernel, L, chunk_T, Bp, Hg, T, Tp),
        out_shape=(jax.ShapeDtypeStruct((Tp * Bp, Op), jnp.float32),
                   jax.ShapeDtypeStruct((L, Bp, Hg), jnp.float32),
                   jax.ShapeDtypeStruct((L, Bp, Hg), jnp.float32)),
        grid=(n_chunks,),
        in_specs=[pl.BlockSpec((CR, In_pad), lambda c: (c, 0))]
                 + [pl.BlockSpec(w.shape, lambda c: (0, 0)) for w in flat_w]
                 + [pl.BlockSpec(out_wT.shape, lambda c: (0, 0)),
                    pl.BlockSpec(out_b.shape, lambda c: (0, 0)),
                    pl.BlockSpec((L, Bp, Hg), lambda c: (0, 0, 0)),
                    pl.BlockSpec((L, Bp, Hg), lambda c: (0, 0, 0))],
        out_specs=[pl.BlockSpec((CR, Op), lambda c: (c, 0)),
                   pl.BlockSpec((L, Bp, Hg), lambda c: (0, 0, 0)),
                   pl.BlockSpec((L, Bp, Hg), lambda c: (0, 0, 0))],
        scratch_shapes=[pltpu.VMEM((CR, 4 * Hg), jnp.float32),   # gates-x slab
                        pltpu.VMEM((CR, Hg), jnp.bfloat16)],     # hidden slab
        compiler_params=pltpu.CompilerParams(
            dimension_semantics=("arbitrary",),       # sequential recurrence axis
            vmem_limit_bytes=vmem_limit),
    )(x2d, *flat_w, out_wT, out_b, h0_p, c0_p)

    output = jnp.transpose(
        out2d.reshape(Tp, Bp, Op)[:T, :B, :output_dim], (1, 0, 2)).astype(x.dtype)
    h_n = hN[:, :B, :hidden_dim].astype(x.dtype)
    c_n = cN[:, :B, :hidden_dim].astype(x.dtype)
    return output, (h_n, c_n)


# ---------------------------------------------------------------------------
# Parameter init (PyTorch-style U(-1/sqrt(H), 1/sqrt(H))) and padding/packing.
# ---------------------------------------------------------------------------
def init_raw_params(key, input_dim, hidden_dim, output_dim, num_layers):
    bound = 1.0 / (hidden_dim ** 0.5)
    layers = []
    for li in range(num_layers):
        in_sz = input_dim if li == 0 else hidden_dim
        key, k1, k2, k3, k4 = jax.random.split(key, 5)
        w_ih = jax.random.uniform(k1, (4 * hidden_dim, in_sz), jnp.float32, -bound, bound)
        w_hh = jax.random.uniform(k2, (4 * hidden_dim, hidden_dim), jnp.float32, -bound, bound)
        b_ih = jax.random.uniform(k3, (4 * hidden_dim,), jnp.float32, -bound, bound)
        b_hh = jax.random.uniform(k4, (4 * hidden_dim,), jnp.float32, -bound, bound)
        layers.append((w_ih, w_hh, b_ih, b_hh))
    key, k5, k6 = jax.random.split(key, 3)
    w_out = jax.random.uniform(k5, (output_dim, hidden_dim), jnp.float32, -bound, bound)
    b_out = jax.random.uniform(k6, (output_dim,), jnp.float32, -bound, bound)
    return tuple(layers), w_out, b_out


def _pad_gate_cols(wT, H, Hg):
    """(rows, 4H) -> (rows, 4Hg), gate g placed at columns [g*Hg, g*Hg+H)."""
    if Hg == H:
        return wT
    rows = wT.shape[0]
    out = jnp.zeros((rows, 4 * Hg), wT.dtype)
    for g in range(4):
        out = out.at[:, g * Hg:g * Hg + H].set(wT[:, g * H:(g + 1) * H])
    return out


def _pad_rows(wT, rows_pad):
    if wT.shape[0] == rows_pad:
        return wT
    return jnp.zeros((rows_pad,) + wT.shape[1:], wT.dtype).at[:wT.shape[0]].set(wT)


def prepare_params(layers_raw, w_out, b_out, hidden_dim):
    """Transpose + pad + bf16-cast weights into the layout the kernel expects."""
    H = hidden_dim
    Hg = _gate_stride(H)
    packed = []
    for li, (w_ih, w_hh, b_ih, b_hh) in enumerate(layers_raw):
        wihT = w_ih.T                                   # (in_sz, 4H)
        rows_pad = _round_up(wihT.shape[0], 128) if li == 0 else Hg
        wihT_p = _pad_gate_cols(_pad_rows(wihT, rows_pad), H, Hg).astype(jnp.bfloat16)
        whhT_p = _pad_gate_cols(_pad_rows(w_hh.T, Hg), H, Hg).astype(jnp.bfloat16)
        b_p = _pad_gate_cols((b_ih + b_hh)[None, :], H, Hg).astype(jnp.float32)
        packed.append((wihT_p, whhT_p, b_p))
    O = w_out.shape[0]
    Op = _round_up(O, 128)                              # lane-dense output head
    out_wT = jnp.zeros((Hg, Op), jnp.float32).at[:H, :O].set(w_out.T).astype(jnp.bfloat16)
    out_b = jnp.zeros((1, Op), jnp.float32).at[0, :O].set(b_out)
    return tuple(packed), out_wT, out_b


# ---------------------------------------------------------------------------
# Pure-JAX reference (PyTorch nn.LSTM eval semantics) for correctness check.
# ---------------------------------------------------------------------------
def lstm_reference(x, layers_raw, w_out, b_out, h0, c0):
    B, T, _ = x.shape
    H = h0.shape[-1]
    layer_in = x
    h_fin, c_fin = [], []
    for li, (w_ih, w_hh, b_ih, b_hh) in enumerate(layers_raw):
        h, c = h0[li], c0[li]
        outs = []
        for t in range(T):
            gates = layer_in[:, t, :] @ w_ih.T + h @ w_hh.T + b_ih + b_hh
            i_g = jax.nn.sigmoid(gates[:, 0 * H:1 * H])
            f_g = jax.nn.sigmoid(gates[:, 1 * H:2 * H])
            g_g = jnp.tanh(gates[:, 2 * H:3 * H])
            o_g = jax.nn.sigmoid(gates[:, 3 * H:4 * H])
            c = f_g * c + i_g * g_g
            h = o_g * jnp.tanh(c)
            outs.append(h)
        layer_in = jnp.stack(outs, axis=1)
        h_fin.append(h)
        c_fin.append(c)
    out = layer_in @ w_out.T + b_out
    return out, (jnp.stack(h_fin), jnp.stack(c_fin))


if __name__ == "__main__":
    batch, seq = 2, 8
    input_dim, hidden_dim, output_dim, num_layers = 16, 32, 8, 2

    key = jax.random.PRNGKey(0)
    key, kx, kh, kc = jax.random.split(key, 4)
    x = jax.random.normal(kx, (batch, seq, input_dim), jnp.float32)
    # Non-zero initial states exercise the hiddens path (PyTorch default is zeros).
    h0 = 0.1 * jax.random.normal(kh, (num_layers, batch, hidden_dim), jnp.float32)
    c0 = 0.1 * jax.random.normal(kc, (num_layers, batch, hidden_dim), jnp.float32)

    layers_raw, w_out, b_out = init_raw_params(
        key, input_dim, hidden_dim, output_dim, num_layers)
    layer_params, out_wT, out_b = prepare_params(layers_raw, w_out, b_out, hidden_dim)

    ref_out, (ref_h, ref_c) = lstm_reference(x, layers_raw, w_out, b_out, h0, c0)

    # time_chunk=4: even chunking (2 chunks); time_chunk=3: ragged last chunk
    # (exercises the padded-timestep carry guard).
    for tc in (4, 3):
        output, (h_n, c_n) = rnn_forward(
            x, layer_params, out_wT, out_b, h0, c0,
            hidden_dim=hidden_dim, output_dim=output_dim, time_chunk=tc)
        jax.block_until_ready((output, h_n, c_n))

        assert output.shape == (batch, seq, output_dim)
        assert h_n.shape == (num_layers, batch, hidden_dim)
        assert c_n.shape == (num_layers, batch, hidden_dim)

        # bf16 weights/operands (f32 accumulation) -> loose-ish tolerance.
        assert jnp.allclose(output, ref_out, rtol=2e-2, atol=2e-2), f"output mismatch tc={tc}"
        assert jnp.allclose(h_n, ref_h, rtol=2e-2, atol=2e-2), f"h_n mismatch tc={tc}"
        assert jnp.allclose(c_n, ref_c, rtol=2e-2, atol=2e-2), f"c_n mismatch tc={tc}"

    print("KERNEL_OK")
</pallas_src>

<mosaic_0001>
module attributes {stable_mosaic.version = 11 : i64} {
  func.func @_fused_lstm_kernel(%arg0: i32, %arg1: memref<32x128xf32, #tpu.memory_space<vmem>>, %arg2: memref<128x128xbf16, #tpu.memory_space<vmem>>, %arg3: memref<32x128xbf16, #tpu.memory_space<vmem>>, %arg4: memref<1x128xf32, #tpu.memory_space<vmem>>, %arg5: memref<32x128xbf16, #tpu.memory_space<vmem>>, %arg6: memref<32x128xbf16, #tpu.memory_space<vmem>>, %arg7: memref<1x128xf32, #tpu.memory_space<vmem>>, %arg8: memref<32x128xbf16, #tpu.memory_space<vmem>>, %arg9: memref<1x128xf32, #tpu.memory_space<vmem>>, %arg10: memref<2x8x32xf32, #tpu.memory_space<vmem>>, %arg11: memref<2x8x32xf32, #tpu.memory_space<vmem>>, %arg12: memref<32x128xf32, #tpu.memory_space<vmem>>, %arg13: memref<2x8x32xf32, #tpu.memory_space<vmem>>, %arg14: memref<2x8x32xf32, #tpu.memory_space<vmem>>, %arg15: memref<32x128xf32, #tpu.memory_space<vmem>>, %arg16: memref<32x32xbf16, #tpu.memory_space<vmem>>) attributes {dimension_semantics = [#tpu.dimension_semantics<arbitrary>], iteration_bounds = array<i64: 2>, scalar_prefetch = 0 : i64, scratch_operands = 2 : i64, tpu.core_type = #tpu.core_type<tc>, window_params = [{transform_indices = @transform_0, window_bounds = array<i64: 32, 128>}, {pipeline_mode = #tpu.pipeline_mode<synchronous>, transform_indices = @transform_1, window_bounds = array<i64: 128, 128>}, {pipeline_mode = #tpu.pipeline_mode<synchronous>, transform_indices = @transform_2, window_bounds = array<i64: 32, 128>}, {pipeline_mode = #tpu.pipeline_mode<synchronous>, transform_indices = @transform_3, window_bounds = array<i64: 1, 128>}, {pipeline_mode = #tpu.pipeline_mode<synchronous>, transform_indices = @transform_4, window_bounds = array<i64: 32, 128>}, {pipeline_mode = #tpu.pipeline_mode<synchronous>, transform_indices = @transform_5, window_bounds = array<i64: 32, 128>}, {pipeline_mode = #tpu.pipeline_mode<synchronous>, transform_indices = @transform_6, window_bounds = array<i64: 1, 128>}, {pipeline_mode = #tpu.pipeline_mode<synchronous>, transform_indices = @transform_7, window_bounds = array<i64: 32, 128>}, {pipeline_mode = #tpu.pipeline_mode<synchronous>, transform_indices = @transform_8, window_bounds = array<i64: 1, 128>}, {pipeline_mode = #tpu.pipeline_mode<synchronous>, transform_indices = @transform_9, window_bounds = array<i64: 2, 8, 32>}, {pipeline_mode = #tpu.pipeline_mode<synchronous>, transform_indices = @transform_10, window_bounds = array<i64: 2, 8, 32>}, {transform_indices = @transform_11, window_bounds = array<i64: 32, 128>}, {pipeline_mode = #tpu.pipeline_mode<synchronous>, transform_indices = @transform_12, window_bounds = array<i64: 2, 8, 32>}, {pipeline_mode = #tpu.pipeline_mode<synchronous>, transform_indices = @transform_13, window_bounds = array<i64: 2, 8, 32>}]} {
    %c0_i32 = arith.constant 0 : i32
    %0 = arith.cmpi eq, %arg0, %c0_i32 : i32
    %1 = arith.extui %0 : i1 to i32
    %c0_i32_0 = arith.constant 0 : i32
    %2 = arith.cmpi ne, %1, %c0_i32_0 : i32
    scf.if %2 {
      %c0_126 = arith.constant 0 : index
      %c0_127 = arith.constant 0 : index
      %c0_128 = arith.constant 0 : index
      %333 = vector.load %arg10[%c0_126, %c0_127, %c0_128] : memref<2x8x32xf32, #tpu.memory_space<vmem>>, vector<2x8x32xf32>
      %c0_129 = arith.constant 0 : index
      %c0_130 = arith.constant 0 : index
      %c0_131 = arith.constant 0 : index
      %334 = vector.load %arg13[%c0_129, %c0_130, %c0_131] : memref<2x8x32xf32, #tpu.memory_space<vmem>>, vector<2x8x32xf32>
      tpu.vector_store %arg13[%c0_129, %c0_130, %c0_131], %333 {strides = array<i32>} : memref<2x8x32xf32, #tpu.memory_space<vmem>>, vector<2x8x32xf32>,
      %c0_132 = arith.constant 0 : index
      %c0_133 = arith.constant 0 : index
      %c0_134 = arith.constant 0 : index
      %335 = vector.load %arg11[%c0_132, %c0_133, %c0_134] : memref<2x8x32xf32, #tpu.memory_space<vmem>>, vector<2x8x32xf32>
      %c0_135 = arith.constant 0 : index
      %c0_136 = arith.constant 0 : index
      %c0_137 = arith.constant 0 : index
      %336 = vector.load %arg14[%c0_135, %c0_136, %c0_137] : memref<2x8x32xf32, #tpu.memory_space<vmem>>, vector<2x8x32xf32>
      tpu.vector_store %arg14[%c0_135, %c0_136, %c0_137], %335 {strides = array<i32>} : memref<2x8x32xf32, #tpu.memory_space<vmem>>, vector<2x8x32xf32>,
    } else {
    }
    %c0 = arith.constant 0 : index
    %c0_1 = arith.constant 0 : index
    %3 = vector.load %arg1[%c0, %c0_1] : memref<32x128xf32, #tpu.memory_space<vmem>>, vector<32x128xf32>
    %4 = arith.truncf %3 : vector<32x128xf32> to vector<32x128xbf16>
    %c0_2 = arith.constant 0 : index
    %c0_3 = arith.constant 0 : index
    %5 = vector.load %arg2[%c0_2, %c0_3] : memref<128x128xbf16, #tpu.memory_space<vmem>>, vector<128x128xbf16>
    %cst = arith.constant dense<0.000000e+00> : vector<32x128xf32>
    %6 = tpu.matmul %4, %5, %cst {dimension_numbers = #tpu.dot_dimension_numbers<[1], [0], [0], [1], [0, 0, 1, 1], [], []>} : vector<32x128xbf16>, vector<128x128xbf16>, vector<32x128xf32> -> vector<32x128xf32>
    %c0_4 = arith.constant 0 : index
    %c0_5 = arith.constant 0 : index
    %7 = vector.load %arg4[%c0_4, %c0_5] : memref<1x128xf32, #tpu.memory_space<vmem>>, vector<1x128xf32>
    %8 = vector.broadcast %7 : vector<1x128xf32> to vector<32x128xf32>
    %9 = arith.addf %6, %8 : vector<32x128xf32>
    %c0_6 = arith.constant 0 : index
    %c0_7 = arith.constant 0 : index
    %10 = vector.load %arg15[%c0_6, %c0_7] : memref<32x128xf32, #tpu.memory_space<vmem>>, vector<32x128xf32>
    tpu.vector_store %arg15[%c0_6, %c0_7], %9 {strides = array<i32>} : memref<32x128xf32, #tpu.memory_space<vmem>>, vector<32x128xf32>,
    %c0_8 = arith.constant 0 : index
    %c0_9 = arith.constant 0 : index
    %c0_10 = arith.constant 0 : index
    %11 = vector.load %arg13[%c0_8, %c0_9, %c0_10] : memref<2x8x32xf32, #tpu.memory_space<vmem>>, vector<1x8x32xf32>
    %12 = vector.shape_cast %11 : vector<1x8x32xf32> to vector<8x32xf32>
    %c0_11 = arith.constant 0 : index
    %c0_12 = arith.constant 0 : index
    %c0_13 = arith.constant 0 : index
    %13 = vector.load %arg14[%c0_11, %c0_12, %c0_13] : memref<2x8x32xf32, #tpu.memory_space<vmem>>, vector<1x8x32xf32>
    %14 = vector.shape_cast %13 : vector<1x8x32xf32> to vector<8x32xf32>
    %c0_i32_14 = arith.constant 0 : i32
    %c8_i32 = arith.constant 8 : i32
    %15 = arith.muli %c0_i32_14, %c8_i32 : i32
    %16 = tpu.assume_multiple %15, 8 : i32
    %17 = arith.index_cast %16 : i32 to index
    %c0_15 = arith.constant 0 : index
    %18 = vector.load %arg15[%17, %c0_15] : memref<32x128xf32, #tpu.memory_space<vmem>>, vector<8x128xf32>
    %19 = arith.truncf %12 : vector<8x32xf32> to vector<8x32xbf16>
    %c0_16 = arith.constant 0 : index
    %c0_17 = arith.constant 0 : index
    %20 = vector.load %arg3[%c0_16, %c0_17] : memref<32x128xbf16, #tpu.memory_space<vmem>>, vector<32x128xbf16>
    %cst_18 = arith.constant dense<0.000000e+00> : vector<8x128xf32>
    %21 = tpu.matmul %19, %20, %cst_18 {dimension_numbers = #tpu.dot_dimension_numbers<[1], [0], [0], [1], [0, 0, 1, 1], [], []>} : vector<8x32xbf16>, vector<32x128xbf16>, vector<8x128xf32> -> vector<8x128xf32>
    %22 = arith.addf %18, %21 : vector<8x128xf32>
    %23 = vector.extract_strided_slice %22 {offsets = [0, 0], sizes = [8, 32], strides = [1, 1]} : vector<8x128xf32> to vector<8x32xf32>
    %24 = arith.negf %23 : vector<8x32xf32>
    %25 = math.exp %24 : vector<8x32xf32>
    %cst_19 = arith.constant 1.000000e+00 : f32
    %26 = vector.broadcast %cst_19 : f32 to vector<8x32xf32>
    %27 = arith.addf %26, %25 : vector<8x32xf32>
    %28 = arith.divf %26, %27 : vector<8x32xf32>
    %29 = vector.extract_strided_slice %22 {offsets = [0, 32], sizes = [8, 32], strides = [1, 1]} : vector<8x128xf32> to vector<8x32xf32>
    %30 = arith.negf %29 : vector<8x32xf32>
    %31 = math.exp %30 : vector<8x32xf32>
    %cst_20 = arith.constant 1.000000e+00 : f32
    %32 = vector.broadcast %cst_20 : f32 to vector<8x32xf32>
    %33 = arith.addf %32, %31 : vector<8x32xf32>
    %34 = arith.divf %32, %33 : vector<8x32xf32>
    %35 = vector.extract_strided_slice %22 {offsets = [0, 64], sizes = [8, 32], strides = [1, 1]} : vector<8x128xf32> to vector<8x32xf32>
    %36 = math.tanh %35 : vector<8x32xf32>
    %37 = vector.extract_strided_slice %22 {offsets = [0, 96], sizes = [8, 32], strides = [1, 1]} : vector<8x128xf32> to vector<8x32xf32>
    %38 = arith.negf %37 : vector<8x32xf32>
    %39 = math.exp %38 : vector<8x32xf32>
    %cst_21 = arith.constant 1.000000e+00 : f32
    %40 = vector.broadcast %cst_21 : f32 to vector<8x32xf32>
    %41 = arith.addf %40, %39 : vector<8x32xf32>
    %42 = arith.divf %40, %41 : vector<8x32xf32>
    %43 = arith.mulf %34, %14 : vector<8x32xf32>
    %44 = arith.mulf %28, %36 : vector<8x32xf32>
    %45 = arith.addf %43, %44 : vector<8x32xf32>
    %46 = math.tanh %45 : vector<8x32xf32>
    %47 = arith.mulf %42, %46 : vector<8x32xf32>
    %48 = arith.truncf %47 : vector<8x32xf32> to vector<8x32xbf16>
    %49 = arith.index_cast %16 : i32 to index
    %c0_22 = arith.constant 0 : index
    %50 = vector.load %arg16[%49, %c0_22] : memref<32x32xbf16, #tpu.memory_space<vmem>>, vector<8x32xbf16>
    tpu.vector_store %arg16[%49, %c0_22], %48 {strides = array<i32>} : memref<32x32xbf16, #tpu.memory_space<vmem>>, vector<8x32xbf16>,
    %c1_i32 = arith.constant 1 : i32
    %c8_i32_23 = arith.constant 8 : i32
    %51 = arith.muli %c1_i32, %c8_i32_23 : i32
    %52 = tpu.assume_multiple %51, 8 : i32
    %53 = arith.index_cast %52 : i32 to index
    %c0_24 = arith.constant 0 : index
    %54 = vector.load %arg15[%53, %c0_24] : memref<32x128xf32, #tpu.memory_space<vmem>>, vector<8x128xf32>
    %55 = arith.truncf %47 : vector<8x32xf32> to vector<8x32xbf16>
    %c0_25 = arith.constant 0 : index
    %c0_26 = arith.constant 0 : index
    %56 = vector.load %arg3[%c0_25, %c0_26] : memref<32x128xbf16, #tpu.memory_space<vmem>>, vector<32x128xbf16>
    %cst_27 = arith.constant dense<0.000000e+00> : vector<8x128xf32>
    %57 = tpu.matmul %55, %56, %cst_27 {dimension_numbers = #tpu.dot_dimension_numbers<[1], [0], [0], [1], [0, 0, 1, 1], [], []>} : vector<8x32xbf16>, vector<32x128xbf16>, vector<8x128xf32> -> vector<8x128xf32>
    %58 = arith.addf %54, %57 : vector<8x128xf32>
    %59 = vector.extract_strided_slice %58 {offsets = [0, 0], sizes = [8, 32], strides = [1, 1]} : vector<8x128xf32> to vector<8x32xf32>
    %60 = arith.negf %59 : vector<8x32xf32>
    %61 = math.exp %60 : vector<8x32xf32>
    %cst_28 = arith.constant 1.000000e+00 : f32
    %62 = vector.broadcast %cst_28 : f32 to vector<8x32xf32>
    %63 = arith.addf %62, %61 : vector<8x32xf32>
    %64 = arith.divf %62, %63 : vector<8x32xf32>
    %65 = vector.extract_strided_slice %58 {offsets = [0, 32], sizes = [8, 32], strides = [1, 1]} : vector<8x128xf32> to vector<8x32xf32>
    %66 = arith.negf %65 : vector<8x32xf32>
    %67 = math.exp %66 : vector<8x32xf32>
    %cst_29 = arith.constant 1.000000e+00 : f32
    %68 = vector.broadcast %cst_29 : f32 to vector<8x32xf32>
    %69 = arith.addf %68, %67 : vector<8x32xf32>
    %70 = arith.divf %68, %69 : vector<8x32xf32>
    %71 = vector.extract_strided_slice %58 {offsets = [0, 64], sizes = [8, 32], strides = [1, 1]} : vector<8x128xf32> to vector<8x32xf32>
    %72 = math.tanh %71 : vector<8x32xf32>
    %73 = vector.extract_strided_slice %58 {offsets = [0, 96], sizes = [8, 32], strides = [1, 1]} : vector<8x128xf32> to vector<8x32xf32>
    %74 = arith.negf %73 : vector<8x32xf32>
    %75 = math.exp %74 : vector<8x32xf32>
    %cst_30 = arith.constant 1.000000e+00 : f32
    %76 = vector.broadcast %cst_30 : f32 to vector<8x32xf32>
    %77 = arith.addf %76, %75 : vector<8x32xf32>
    %78 = arith.divf %76, %77 : vector<8x32xf32>
    %79 = arith.mulf %70, %45 : vector<8x32xf32>
    %80 = arith.mulf %64, %72 : vector<8x32xf32>
    %81 = arith.addf %79, %80 : vector<8x32xf32>
    %82 = math.tanh %81 : vector<8x32xf32>
    %83 = arith.mulf %78, %82 : vector<8x32xf32>
    %84 = arith.truncf %83 : vector<8x32xf32> to vector<8x32xbf16>
    %85 = arith.index_cast %52 : i32 to index
    %c0_31 = arith.constant 0 : index
    %86 = vector.load %arg16[%85, %c0_31] : memref<32x32xbf16, #tpu.memory_space<vmem>>, vector<8x32xbf16>
    tpu.vector_store %arg16[%85, %c0_31], %84 {strides = array<i32>} : memref<32x32xbf16, #tpu.memory_space<vmem>>, vector<8x32xbf16>,
    %c2_i32 = arith.constant 2 : i32
    %c8_i32_32 = arith.constant 8 : i32
    %87 = arith.muli %c2_i32, %c8_i32_32 : i32
    %88 = tpu.assume_multiple %87, 8 : i32
    %89 = arith.index_cast %88 : i32 to index
    %c0_33 = arith.constant 0 : index
    %90 = vector.load %arg15[%89, %c0_33] : memref<32x128xf32, #tpu.memory_space<vmem>>, vector<8x128xf32>
    %91 = arith.truncf %83 : vector<8x32xf32> to vector<8x32xbf16>
    %c0_34 = arith.constant 0 : index
    %c0_35 = arith.constant 0 : index
    %92 = vector.load %arg3[%c0_34, %c0_35] : memref<32x128xbf16, #tpu.memory_space<vmem>>, vector<32x128xbf16>
    %cst_36 = arith.constant dense<0.000000e+00> : vector<8x128xf32>
    %93 = tpu.matmul %91, %92, %cst_36 {dimension_numbers = #tpu.dot_dimension_numbers<[1], [0], [0], [1], [0, 0, 1, 1], [], []>} : vector<8x32xbf16>, vector<32x128xbf16>, vector<8x128xf32> -> vector<8x128xf32>
    %94 = arith.addf %90, %93 : vector<8x128xf32>
    %95 = vector.extract_strided_slice %94 {offsets = [0, 0], sizes = [8, 32], strides = [1, 1]} : vector<8x128xf32> to vector<8x32xf32>
    %96 = arith.negf %95 : vector<8x32xf32>
    %97 = math.exp %96 : vector<8x32xf32>
    %cst_37 = arith.constant 1.000000e+00 : f32
    %98 = vector.broadcast %cst_37 : f32 to vector<8x32xf32>
    %99 = arith.addf %98, %97 : vector<8x32xf32>
    %100 = arith.divf %98, %99 : vector<8x32xf32>
    %101 = vector.extract_strided_slice %94 {offsets = [0, 32], sizes = [8, 32], strides = [1, 1]} : vector<8x128xf32> to vector<8x32xf32>
    %102 = arith.negf %101 : vector<8x32xf32>
    %103 = math.exp %102 : vector<8x32xf32>
    %cst_38 = arith.constant 1.000000e+00 : f32
    %104 = vector.broadcast %cst_38 : f32 to vector<8x32xf32>
    %105 = arith.addf %104, %103 : vector<8x32xf32>
    %106 = arith.divf %104, %105 : vector<8x32xf32>
    %107 = vector.extract_strided_slice %94 {offsets = [0, 64], sizes = [8, 32], strides = [1, 1]} : vector<8x128xf32> to vector<8x32xf32>
    %108 = math.tanh %107 : vector<8x32xf32>
    %109 = vector.extract_strided_slice %94 {offsets = [0, 96], sizes = [8, 32], strides = [1, 1]} : vector<8x128xf32> to vector<8x32xf32>
    %110 = arith.negf %109 : vector<8x32xf32>
    %111 = math.exp %110 : vector<8x32xf32>
    %cst_39 = arith.constant 1.000000e+00 : f32
    %112 = vector.broadcast %cst_39 : f32 to vector<8x32xf32>
    %113 = arith.addf %112, %111 : vector<8x32xf32>
    %114 = arith.divf %112, %113 : vector<8x32xf32>
    %115 = arith.mulf %106, %81 : vector<8x32xf32>
    %116 = arith.mulf %100, %108 : vector<8x32xf32>
    %117 = arith.addf %115, %116 : vector<8x32xf32>
    %118 = math.tanh %117 : vector<8x32xf32>
    %119 = arith.mulf %114, %118 : vector<8x32xf32>
    %120 = arith.truncf %119 : vector<8x32xf32> to vector<8x32xbf16>
    %121 = arith.index_cast %88 : i32 to index
    %c0_40 = arith.constant 0 : index
    %122 = vector.load %arg16[%121, %c0_40] : memref<32x32xbf16, #tpu.memory_space<vmem>>, vector<8x32xbf16>
    tpu.vector_store %arg16[%121, %c0_40], %120 {strides = array<i32>} : memref<32x32xbf16, #tpu.memory_space<vmem>>, vector<8x32xbf16>,
    %c3_i32 = arith.constant 3 : i32
    %c8_i32_41 = arith.constant 8 : i32
    %123 = arith.muli %c3_i32, %c8_i32_41 : i32
    %124 = tpu.assume_multiple %123, 8 : i32
    %125 = arith.index_cast %124 : i32 to index
    %c0_42 = arith.constant 0 : index
    %126 = vector.load %arg15[%125, %c0_42] : memref<32x128xf32, #tpu.memory_space<vmem>>, vector<8x128xf32>
    %127 = arith.truncf %119 : vector<8x32xf32> to vector<8x32xbf16>
    %c0_43 = arith.constant 0 : index
    %c0_44 = arith.constant 0 : index
    %128 = vector.load %arg3[%c0_43, %c0_44] : memref<32x128xbf16, #tpu.memory_space<vmem>>, vector<32x128xbf16>
    %cst_45 = arith.constant dense<0.000000e+00> : vector<8x128xf32>
    %129 = tpu.matmul %127, %128, %cst_45 {dimension_numbers = #tpu.dot_dimension_numbers<[1], [0], [0], [1], [0, 0, 1, 1], [], []>} : vector<8x32xbf16>, vector<32x128xbf16>, vector<8x128xf32> -> vector<8x128xf32>
    %130 = arith.addf %126, %129 : vector<8x128xf32>
    %131 = vector.extract_strided_slice %130 {offsets = [0, 0], sizes = [8, 32], strides = [1, 1]} : vector<8x128xf32> to vector<8x32xf32>
    %132 = arith.negf %131 : vector<8x32xf32>
    %133 = math.exp %132 : vector<8x32xf32>
    %cst_46 = arith.constant 1.000000e+00 : f32
    %134 = vector.broadcast %cst_46 : f32 to vector<8x32xf32>
    %135 = arith.addf %134, %133 : vector<8x32xf32>
    %136 = arith.divf %134, %135 : vector<8x32xf32>
    %137 = vector.extract_strided_slice %130 {offsets = [0, 32], sizes = [8, 32], strides = [1, 1]} : vector<8x128xf32> to vector<8x32xf32>
    %138 = arith.negf %137 : vector<8x32xf32>
    %139 = math.exp %138 : vector<8x32xf32>
    %cst_47 = arith.constant 1.000000e+00 : f32
    %140 = vector.broadcast %cst_47 : f32 to vector<8x32xf32>
    %141 = arith.addf %140, %139 : vector<8x32xf32>
    %142 = arith.divf %140, %141 : vector<8x32xf32>
    %143 = vector.extract_strided_slice %130 {offsets = [0, 64], sizes = [8, 32], strides = [1, 1]} : vector<8x128xf32> to vector<8x32xf32>
    %144 = math.tanh %143 : vector<8x32xf32>
    %145 = vector.extract_strided_slice %130 {offsets = [0, 96], sizes = [8, 32], strides = [1, 1]} : vector<8x128xf32> to vector<8x32xf32>
    %146 = arith.negf %145 : vector<8x32xf32>
    %147 = math.exp %146 : vector<8x32xf32>
    %cst_48 = arith.constant 1.000000e+00 : f32
    %148 = vector.broadcast %cst_48 : f32 to vector<8x32xf32>
    %149 = arith.addf %148, %147 : vector<8x32xf32>
    %150 = arith.divf %148, %149 : vector<8x32xf32>
    %151 = arith.mulf %142, %117 : vector<8x32xf32>
    %152 = arith.mulf %136, %144 : vector<8x32xf32>
    %153 = arith.addf %151, %152 : vector<8x32xf32>
    %154 = math.tanh %153 : vector<8x32xf32>
    %155 = arith.mulf %150, %154 : vector<8x32xf32>
    %156 = arith.truncf %155 : vector<8x32xf32> to vector<8x32xbf16>
    %157 = arith.index_cast %124 : i32 to index
    %c0_49 = arith.constant 0 : index
    %158 = vector.load %arg16[%157, %c0_49] : memref<32x32xbf16, #tpu.memory_space<vmem>>, vector<8x32xbf16>
    tpu.vector_store %arg16[%157, %c0_49], %156 {strides = array<i32>} : memref<32x32xbf16, #tpu.memory_space<vmem>>, vector<8x32xbf16>,
    %c4_i32 = arith.constant 4 : i32
    %c0_50 = arith.constant 0 : index
    %c0_51 = arith.constant 0 : index
    %c0_52 = arith.constant 0 : index
    %159 = vector.load %arg13[%c0_50, %c0_51, %c0_52] : memref<2x8x32xf32, #tpu.memory_space<vmem>>, vector<1x8x32xf32>
    %160 = vector.shape_cast %159 : vector<1x8x32xf32> to vector<8x32xf32>
    %161 = vector.shape_cast %155 : vector<8x32xf32> to vector<1x8x32xf32>
    tpu.vector_store %arg13[%c0_50, %c0_51, %c0_52], %161 {strides = array<i32>} : memref<2x8x32xf32, #tpu.memory_space<vmem>>, vector<1x8x32xf32>,
    %c0_53 = arith.constant 0 : index
    %c0_54 = arith.constant 0 : index
    %c0_55 = arith.constant 0 : index
    %162 = vector.load %arg14[%c0_53, %c0_54, %c0_55] : memref<2x8x32xf32, #tpu.memory_space<vmem>>, vector<1x8x32xf32>
    %163 = vector.shape_cast %162 : vector<1x8x32xf32> to vector<8x32xf32>
    %164 = vector.shape_cast %153 : vector<8x32xf32> to vector<1x8x32xf32>
    tpu.vector_store %arg14[%c0_53, %c0_54, %c0_55], %164 {strides = array<i32>} : memref<2x8x32xf32, #tpu.memory_space<vmem>>, vector<1x8x32xf32>,
    %c0_56 = arith.constant 0 : index
    %c0_57 = arith.constant 0 : index
    %165 = vector.load %arg16[%c0_56, %c0_57] : memref<32x32xbf16, #tpu.memory_space<vmem>>, vector<32x32xbf16>
    %c0_58 = arith.constant 0 : index
    %c0_59 = arith.constant 0 : index
    %166 = vector.load %arg5[%c0_58, %c0_59] : memref<32x128xbf16, #tpu.memory_space<vmem>>, vector<32x128xbf16>
    %cst_60 = arith.constant dense<0.000000e+00> : vector<32x128xf32>
    %167 = tpu.matmul %165, %166, %cst_60 {dimension_numbers = #tpu.dot_dimension_numbers<[1], [0], [0], [1], [0, 0, 1, 1], [], []>} : vector<32x32xbf16>, vector<32x128xbf16>, vector<32x128xf32> -> vector<32x128xf32>
    %c0_61 = arith.constant 0 : index
    %c0_62 = arith.constant 0 : index
    %168 = vector.load %arg7[%c0_61, %c0_62] : memref<1x128xf32, #tpu.memory_space<vmem>>, vector<1x128xf32>
    %169 = vector.broadcast %168 : vector<1x128xf32> to vector<32x128xf32>
    %170 = arith.addf %167, %169 : vector<32x128xf32>
    %c0_63 = arith.constant 0 : index
    %c0_64 = arith.constant 0 : index
    %171 = vector.load %arg15[%c0_63, %c0_64] : memref<32x128xf32, #tpu.memory_space<vmem>>, vector<32x128xf32>
    tpu.vector_store %arg15[%c0_63, %c0_64], %170 {strides = array<i32>} : memref<32x128xf32, #tpu.memory_space<vmem>>, vector<32x128xf32>,
    %c1 = arith.constant 1 : index
    %c0_65 = arith.constant 0 : index
    %c0_66 = arith.constant 0 : index
    %172 = vector.load %arg13[%c1, %c0_65, %c0_66] : memref<2x8x32xf32, #tpu.memory_space<vmem>>, vector<1x8x32xf32>
    %173 = vector.shape_cast %172 : vector<1x8x32xf32> to vector<8x32xf32>
    %c1_67 = arith.constant 1 : index
    %c0_68 = arith.constant 0 : index
    %c0_69 = arith.constant 0 : index
    %174 = vector.load %arg14[%c1_67, %c0_68, %c0_69] : memref<2x8x32xf32, #tpu.memory_space<vmem>>, vector<1x8x32xf32>
    %175 = vector.shape_cast %174 : vector<1x8x32xf32> to vector<8x32xf32>
    %c0_i32_70 = arith.constant 0 : i32
    %c8_i32_71 = arith.constant 8 : i32
    %176 = arith.muli %c0_i32_70, %c8_i32_71 : i32
    %177 = tpu.assume_multiple %176, 8 : i32
    %178 = arith.index_cast %177 : i32 to index
    %c0_72 = arith.constant 0 : index
    %179 = vector.load %arg15[%178, %c0_72] : memref<32x128xf32, #tpu.memory_space<vmem>>, vector<8x128xf32>
    %180 = arith.truncf %173 : vector<8x32xf32> to vector<8x32xbf16>
    %c0_73 = arith.constant 0 : index
    %c0_74 = arith.constant 0 : index
    %181 = vector.load %arg6[%c0_73, %c0_74] : memref<32x128xbf16, #tpu.memory_space<vmem>>, vector<32x128xbf16>
    %cst_75 = arith.constant dense<0.000000e+00> : vector<8x128xf32>
    %182 = tpu.matmul %180, %181, %cst_75 {dimension_numbers = #tpu.dot_dimension_numbers<[1], [0], [0], [1], [0, 0, 1, 1], [], []>} : vector<8x32xbf16>, vector<32x128xbf16>, vector<8x128xf32> -> vector<8x128xf32>
    %183 = arith.addf %179, %182 : vector<8x128xf32>
    %184 = vector.extract_strided_slice %183 {offsets = [0, 0], sizes = [8, 32], strides = [1, 1]} : vector<8x128xf32> to vector<8x32xf32>
    %185 = arith.negf %184 : vector<8x32xf32>
    %186 = math.exp %185 : vector<8x32xf32>
    %cst_76 = arith.constant 1.000000e+00 : f32
    %187 = vector.broadcast %cst_76 : f32 to vector<8x32xf32>
    %188 = arith.addf %187, %186 : vector<8x32xf32>
    %189 = arith.divf %187, %188 : vector<8x32xf32>
    %190 = vector.extract_strided_slice %183 {offsets = [0, 32], sizes = [8, 32], strides = [1, 1]} : vector<8x128xf32> to vector<8x32xf32>
    %191 = arith.negf %190 : vector<8x32xf32>
    %192 = math.exp %191 : vector<8x32xf32>
    %cst_77 = arith.constant 1.000000e+00 : f32
    %193 = vector.broadcast %cst_77 : f32 to vector<8x32xf32>
    %194 = arith.addf %193, %192 : vector<8x32xf32>
    %195 = arith.divf %193, %194 : vector<8x32xf32>
    %196 = vector.extract_strided_slice %183 {offsets = [0, 64], sizes = [8, 32], strides = [1, 1]} : vector<8x128xf32> to vector<8x32xf32>
    %197 = math.tanh %196 : vector<8x32xf32>
    %198 = vector.extract_strided_slice %183 {offsets = [0, 96], sizes = [8, 32], strides = [1, 1]} : vector<8x128xf32> to vector<8x32xf32>
    %199 = arith.negf %198 : vector<8x32xf32>
    %200 = math.exp %199 : vector<8x32xf32>
    %cst_78 = arith.constant 1.000000e+00 : f32
    %201 = vector.broadcast %cst_78 : f32 to vector<8x32xf32>
    %202 = arith.addf %201, %200 : vector<8x32xf32>
    %203 = arith.divf %201, %202 : vector<8x32xf32>
    %204 = arith.mulf %195, %175 : vector<8x32xf32>
    %205 = arith.mulf %189, %197 : vector<8x32xf32>
    %206 = arith.addf %204, %205 : vector<8x32xf32>
    %207 = math.tanh %206 : vector<8x32xf32>
    %208 = arith.mulf %203, %207 : vector<8x32xf32>
    %209 = arith.truncf %208 : vector<8x32xf32> to vector<8x32xbf16>
    %210 = arith.index_cast %177 : i32 to index
    %c0_79 = arith.constant 0 : index
    %211 = vector.load %arg16[%210, %c0_79] : memref<32x32xbf16, #tpu.memory_space<vmem>>, vector<8x32xbf16>
    tpu.vector_store %arg16[%210, %c0_79], %209 {strides = array<i32>} : memref<32x32xbf16, #tpu.memory_space<vmem>>, vector<8x32xbf16>,
    %c1_i32_80 = arith.constant 1 : i32
    %c8_i32_81 = arith.constant 8 : i32
    %212 = arith.muli %c1_i32_80, %c8_i32_81 : i32
    %213 = tpu.assume_multiple %212, 8 : i32
    %214 = arith.index_cast %213 : i32 to index
    %c0_82 = arith.constant 0 : index
    %215 = vector.load %arg15[%214, %c0_82] : memref<32x128xf32, #tpu.memory_space<vmem>>, vector<8x128xf32>
    %216 = arith.truncf %208 : vector<8x32xf32> to vector<8x32xbf16>
    %c0_83 = arith.constant 0 : index
    %c0_84 = arith.constant 0 : index
    %217 = vector.load %arg6[%c0_83, %c0_84] : memref<32x128xbf16, #tpu.memory_space<vmem>>, vector<32x128xbf16>
    %cst_85 = arith.constant dense<0.000000e+00> : vector<8x128xf32>
    %218 = tpu.matmul %216, %217, %cst_85 {dimension_numbers = #tpu.dot_dimension_numbers<[1], [0], [0], [1], [0, 0, 1, 1], [], []>} : vector<8x32xbf16>, vector<32x128xbf16>, vector<8x128xf32> -> vector<8x128xf32>
    %219 = arith.addf %215, %218 : vector<8x128xf32>
    %220 = vector.extract_strided_slice %219 {offsets = [0, 0], sizes = [8, 32], strides = [1, 1]} : vector<8x128xf32> to vector<8x32xf32>
    %221 = arith.negf %220 : vector<8x32xf32>
    %222 = math.exp %221 : vector<8x32xf32>
    %cst_86 = arith.constant 1.000000e+00 : f32
    %223 = vector.broadcast %cst_86 : f32 to vector<8x32xf32>
    %224 = arith.addf %223, %222 : vector<8x32xf32>
    %225 = arith.divf %223, %224 : vector<8x32xf32>
    %226 = vector.extract_strided_slice %219 {offsets = [0, 32], sizes = [8, 32], strides = [1, 1]} : vector<8x128xf32> to vector<8x32xf32>
    %227 = arith.negf %226 : vector<8x32xf32>
    %228 = math.exp %227 : vector<8x32xf32>
    %cst_87 = arith.constant 1.000000e+00 : f32
    %229 = vector.broadcast %cst_87 : f32 to vector<8x32xf32>
    %230 = arith.addf %229, %228 : vector<8x32xf32>
    %231 = arith.divf %229, %230 : vector<8x32xf32>
    %232 = vector.extract_strided_slice %219 {offsets = [0, 64], sizes = [8, 32], strides = [1, 1]} : vector<8x128xf32> to vector<8x32xf32>
    %233 = math.tanh %232 : vector<8x32xf32>
    %234 = vector.extract_strided_slice %219 {offsets = [0, 96], sizes = [8, 32], strides = [1, 1]} : vector<8x128xf32> to vector<8x32xf32>
    %235 = arith.negf %234 : vector<8x32xf32>
    %236 = math.exp %235 : vector<8x32xf32>
    %cst_88 = arith.constant 1.000000e+00 : f32
    %237 = vector.broadcast %cst_88 : f32 to vector<8x32xf32>
    %238 = arith.addf %237, %236 : vector<8x32xf32>
    %239 = arith.divf %237, %238 : vector<8x32xf32>
    %240 = arith.mulf %231, %206 : vector<8x32xf32>
    %241 = arith.mulf %225, %233 : vector<8x32xf32>
    %242 = arith.addf %240, %241 : vector<8x32xf32>
    %243 = math.tanh %242 : vector<8x32xf32>
    %244 = arith.mulf %239, %243 : vector<8x32xf32>
    %245 = arith.truncf %244 : vector<8x32xf32> to vector<8x32xbf16>
    %246 = arith.index_cast %213 : i32 to index
    %c0_89 = arith.constant 0 : index
    %247 = vector.load %arg16[%246, %c0_89] : memref<32x32xbf16, #tpu.memory_space<vmem>>, vector<8x32xbf16>
    tpu.vector_store %arg16[%246, %c0_89], %245 {strides = array<i32>} : memref<32x32xbf16, #tpu.memory_space<vmem>>, vector<8x32xbf16>,
    %c2_i32_90 = arith.constant 2 : i32
    %c8_i32_91 = arith.constant 8 : i32
    %248 = arith.muli %c2_i32_90, %c8_i32_91 : i32
    %249 = tpu.assume_multiple %248, 8 : i32
    %250 = arith.index_cast %249 : i32 to index
    %c0_92 = arith.constant 0 : index
    %251 = vector.load %arg15[%250, %c0_92] : memref<32x128xf32, #tpu.memory_space<vmem>>, vector<8x128xf32>
    %252 = arith.truncf %244 : vector<8x32xf32> to vector<8x32xbf16>
    %c0_93 = arith.constant 0 : index
    %c0_94 = arith.constant 0 : index
    %253 = vector.load %arg6[%c0_93, %c0_94] : memref<32x128xbf16, #tpu.memory_space<vmem>>, vector<32x128xbf16>
    %cst_95 = arith.constant dense<0.000000e+00> : vector<8x128xf32>
    %254 = tpu.matmul %252, %253, %cst_95 {dimension_numbers = #tpu.dot_dimension_numbers<[1], [0], [0], [1], [0, 0, 1, 1], [], []>} : vector<8x32xbf16>, vector<32x128xbf16>, vector<8x128xf32> -> vector<8x128xf32>
    %255 = arith.addf %251, %254 : vector<8x128xf32>
    %256 = vector.extract_strided_slice %255 {offsets = [0, 0], sizes = [8, 32], strides = [1, 1]} : vector<8x128xf32> to vector<8x32xf32>
    %257 = arith.negf %256 : vector<8x32xf32>
    %258 = math.exp %257 : vector<8x32xf32>
    %cst_96 = arith.constant 1.000000e+00 : f32
    %259 = vector.broadcast %cst_96 : f32 to vector<8x32xf32>
    %260 = arith.addf %259, %258 : vector<8x32xf32>
    %261 = arith.divf %259, %260 : vector<8x32xf32>
    %262 = vector.extract_strided_slice %255 {offsets = [0, 32], sizes = [8, 32], strides = [1, 1]} : vector<8x128xf32> to vector<8x32xf32>
    %263 = arith.negf %262 : vector<8x32xf32>
    %264 = math.exp %263 : vector<8x32xf32>
    %cst_97 = arith.constant 1.000000e+00 : f32
    %265 = vector.broadcast %cst_97 : f32 to vector<8x32xf32>
    %266 = arith.addf %265, %264 : vector<8x32xf32>
    %267 = arith.divf %265, %266 : vector<8x32xf32>
    %268 = vector.extract_strided_slice %255 {offsets = [0, 64], sizes = [8, 32], strides = [1, 1]} : vector<8x128xf32> to vector<8x32xf32>
    %269 = math.tanh %268 : vector<8x32xf32>
    %270 = vector.extract_strided_slice %255 {offsets = [0, 96], sizes = [8, 32], strides = [1, 1]} : vector<8x128xf32> to vector<8x32xf32>
    %271 = arith.negf %270 : vector<8x32xf32>
    %272 = math.exp %271 : vector<8x32xf32>
    %cst_98 = arith.constant 1.000000e+00 : f32
    %273 = vector.broadcast %cst_98 : f32 to vector<8x32xf32>
    %274 = arith.addf %273, %272 : vector<8x32xf32>
    %275 = arith.divf %273, %274 : vector<8x32xf32>
    %276 = arith.mulf %267, %242 : vector<8x32xf32>
    %277 = arith.mulf %261, %269 : vector<8x32xf32>
    %278 = arith.addf %276, %277 : vector<8x32xf32>
    %279 = math.tanh %278 : vector<8x32xf32>
    %280 = arith.mulf %275, %279 : vector<8x32xf32>
    %281 = arith.truncf %280 : vector<8x32xf32> to vector<8x32xbf16>
    %282 = arith.index_cast %249 : i32 to index
    %c0_99 = arith.constant 0 : index
    %283 = vector.load %arg16[%282, %c0_99] : memref<32x32xbf16, #tpu.memory_space<vmem>>, vector<8x32xbf16>
    tpu.vector_store %arg16[%282, %c0_99], %281 {strides = array<i32>} : memref<32x32xbf16, #tpu.memory_space<vmem>>, vector<8x32xbf16>,
    %c3_i32_100 = arith.constant 3 : i32
    %c8_i32_101 = arith.constant 8 : i32
    %284 = arith.muli %c3_i32_100, %c8_i32_101 : i32
    %285 = tpu.assume_multiple %284, 8 : i32
    %286 = arith.index_cast %285 : i32 to index
    %c0_102 = arith.constant 0 : index
    %287 = vector.load %arg15[%286, %c0_102] : memref<32x128xf32, #tpu.memory_space<vmem>>, vector<8x128xf32>
    %288 = arith.truncf %280 : vector<8x32xf32> to vector<8x32xbf16>
    %c0_103 = arith.constant 0 : index
    %c0_104 = arith.constant 0 : index
    %289 = vector.load %arg6[%c0_103, %c0_104] : memref<32x128xbf16, #tpu.memory_space<vmem>>, vector<32x128xbf16>
    %cst_105 = arith.constant dense<0.000000e+00> : vector<8x128xf32>
    %290 = tpu.matmul %288, %289, %cst_105 {dimension_numbers = #tpu.dot_dimension_numbers<[1], [0], [0], [1], [0, 0, 1, 1], [], []>} : vector<8x32xbf16>, vector<32x128xbf16>, vector<8x128xf32> -> vector<8x128xf32>
    %291 = arith.addf %287, %290 : vector<8x128xf32>
    %292 = vector.extract_strided_slice %291 {offsets = [0, 0], sizes = [8, 32], strides = [1, 1]} : vector<8x128xf32> to vector<8x32xf32>
    %293 = arith.negf %292 : vector<8x32xf32>
    %294 = math.exp %293 : vector<8x32xf32>
    %cst_106 = arith.constant 1.000000e+00 : f32
    %295 = vector.broadcast %cst_106 : f32 to vector<8x32xf32>
    %296 = arith.addf %295, %294 : vector<8x32xf32>
    %297 = arith.divf %295, %296 : vector<8x32xf32>
    %298 = vector.extract_strided_slice %291 {offsets = [0, 32], sizes = [8, 32], strides = [1, 1]} : vector<8x128xf32> to vector<8x32xf32>
    %299 = arith.negf %298 : vector<8x32xf32>
    %300 = math.exp %299 : vector<8x32xf32>
    %cst_107 = arith.constant 1.000000e+00 : f32
    %301 = vector.broadcast %cst_107 : f32 to vector<8x32xf32>
    %302 = arith.addf %301, %300 : vector<8x32xf32>
    %303 = arith.divf %301, %302 : vector<8x32xf32>
    %304 = vector.extract_strided_slice %291 {offsets = [0, 64], sizes = [8, 32], strides = [1, 1]} : vector<8x128xf32> to vector<8x32xf32>
    %305 = math.tanh %304 : vector<8x32xf32>
    %306 = vector.extract_strided_slice %291 {offsets = [0, 96], sizes = [8, 32], strides = [1, 1]} : vector<8x128xf32> to vector<8x32xf32>
    %307 = arith.negf %306 : vector<8x32xf32>
    %308 = math.exp %307 : vector<8x32xf32>
    %cst_108 = arith.constant 1.000000e+00 : f32
    %309 = vector.broadcast %cst_108 : f32 to vector<8x32xf32>
    %310 = arith.addf %309, %308 : vector<8x32xf32>
    %311 = arith.divf %309, %310 : vector<8x32xf32>
    %312 = arith.mulf %303, %278 : vector<8x32xf32>
    %313 = arith.mulf %297, %305 : vector<8x32xf32>
    %314 = arith.addf %312, %313 : vector<8x32xf32>
    %315 = math.tanh %314 : vector<8x32xf32>
    %316 = arith.mulf %311, %315 : vector<8x32xf32>
    %317 = arith.truncf %316 : vector<8x32xf32> to vector<8x32xbf16>
    %318 = arith.index_cast %285 : i32 to index
    %c0_109 = arith.constant 0 : index
    %319 = vector.load %arg16[%318, %c0_109] : memref<32x32xbf16, #tpu.memory_space<vmem>>, vector<8x32xbf16>
    tpu.vector_store %arg16[%318, %c0_109], %317 {strides = array<i32>} : memref<32x32xbf16, #tpu.memory_space<vmem>>, vector<8x32xbf16>,
    %c4_i32_110 = arith.constant 4 : i32
    %c1_111 = arith.constant 1 : index
    %c0_112 = arith.constant 0 : index
    %c0_113 = arith.constant 0 : index
    %320 = vector.load %arg13[%c1_111, %c0_112, %c0_113] : memref<2x8x32xf32, #tpu.memory_space<vmem>>, vector<1x8x32xf32>
    %321 = vector.shape_cast %320 : vector<1x8x32xf32> to vector<8x32xf32>
    %322 = vector.shape_cast %316 : vector<8x32xf32> to vector<1x8x32xf32>
    tpu.vector_store %arg13[%c1_111, %c0_112, %c0_113], %322 {strides = array<i32>} : memref<2x8x32xf32, #tpu.memory_space<vmem>>, vector<1x8x32xf32>,
    %c1_114 = arith.constant 1 : index
    %c0_115 = arith.constant 0 : index
    %c0_116 = arith.constant 0 : index
    %323 = vector.load %arg14[%c1_114, %c0_115, %c0_116] : memref<2x8x32xf32, #tpu.memory_space<vmem>>, vector<1x8x32xf32>
    %324 = vector.shape_cast %323 : vector<1x8x32xf32> to vector<8x32xf32>
    %325 = vector.shape_cast %314 : vector<8x32xf32> to vector<1x8x32xf32>
    tpu.vector_store %arg14[%c1_114, %c0_115, %c0_116], %325 {strides = array<i32>} : memref<2x8x32xf32, #tpu.memory_space<vmem>>, vector<1x8x32xf32>,
    %c0_117 = arith.constant 0 : index
    %c0_118 = arith.constant 0 : index
    %326 = vector.load %arg16[%c0_117, %c0_118] : memref<32x32xbf16, #tpu.memory_space<vmem>>, vector<32x32xbf16>
    %c0_119 = arith.constant 0 : index
    %c0_120 = arith.constant 0 : index
    %327 = vector.load %arg8[%c0_119, %c0_120] : memref<32x128xbf16, #tpu.memory_space<vmem>>, vector<32x128xbf16>
    %cst_121 = arith.constant dense<0.000000e+00> : vector<32x128xf32>
    %328 = tpu.matmul %326, %327, %cst_121 {dimension_numbers = #tpu.dot_dimension_numbers<[1], [0], [0], [1], [0, 0, 1, 1], [], []>} : vector<32x32xbf16>, vector<32x128xbf16>, vector<32x128xf32> -> vector<32x128xf32>
    %c0_122 = arith.constant 0 : index
    %c0_123 = arith.constant 0 : index
    %329 = vector.load %arg9[%c0_122, %c0_123] : memref<1x128xf32, #tpu.memory_space<vmem>>, vector<1x128xf32>
    %330 = vector.broadcast %329 : vector<1x128xf32> to vector<32x128xf32>
    %331 = arith.addf %328, %330 : vector<32x128xf32>
    %c0_124 = arith.constant 0 : index
    %c0_125 = arith.constant 0 : index
    %332 = vector.load %arg12[%c0_124, %c0_125] : memref<32x128xf32, #tpu.memory_space<vmem>>, vector<32x128xf32>
    tpu.vector_store %arg12[%c0_124, %c0_125], %331 {strides = array<i32>} : memref<32x128xf32, #tpu.memory_space<vmem>>, vector<32x128xf32>,
    return
  }
  func.func @transform_0(%arg0: i32) -> (i32, i32) {
    %c0_i32 = arith.constant 0 : i32
    %c0_i32_0 = arith.constant 0 : i32
    return %arg0, %c0_i32 : i32, i32
  }
  func.func @transform_1(%arg0: i32) -> (i32, i32) {
    %c0_i32 = arith.constant 0 : i32
    %c0_i32_0 = arith.constant 0 : i32
    %c0_i32_1 = arith.constant 0 : i32
    return %c0_i32, %c0_i32_0 : i32, i32
  }
  func.func @transform_2(%arg0: i32) -> (i32, i32) {
    %c0_i32 = arith.constant 0 : i32
    %c0_i32_0 = arith.constant 0 : i32
    %c0_i32_1 = arith.constant 0 : i32
    return %c0_i32, %c0_i32_0 : i32, i32
  }
  func.func @transform_3(%arg0: i32) -> (i32, i32) {
    %c0_i32 = arith.constant 0 : i32
    %c0_i32_0 = arith.constant 0 : i32
    %c0_i32_1 = arith.constant 0 : i32
    return %c0_i32, %c0_i32_0 : i32, i32
  }
  func.func @transform_4(%arg0: i32) -> (i32, i32) {
    %c0_i32 = arith.constant 0 : i32
    %c0_i32_0 = arith.constant 0 : i32
    %c0_i32_1 = arith.constant 0 : i32
    return %c0_i32, %c0_i32_0 : i32, i32
  }
  func.func @transform_5(%arg0: i32) -> (i32, i32) {
    %c0_i32 = arith.constant 0 : i32
    %c0_i32_0 = arith.constant 0 : i32
    %c0_i32_1 = arith.constant 0 : i32
    return %c0_i32, %c0_i32_0 : i32, i32
  }
  func.func @transform_6(%arg0: i32) -> (i32, i32) {
    %c0_i32 = arith.constant 0 : i32
    %c0_i32_0 = arith.constant 0 : i32
    %c0_i32_1 = arith.constant 0 : i32
    return %c0_i32, %c0_i32_0 : i32, i32
  }
  func.func @transform_7(%arg0: i32) -> (i32, i32) {
    %c0_i32 = arith.constant 0 : i32
    %c0_i32_0 = arith.constant 0 : i32
    %c0_i32_1 = arith.constant 0 : i32
    return %c0_i32, %c0_i32_0 : i32, i32
  }
  func.func @transform_8(%arg0: i32) -> (i32, i32) {
    %c0_i32 = arith.constant 0 : i32
    %c0_i32_0 = arith.constant 0 : i32
    %c0_i32_1 = arith.constant 0 : i32
    return %c0_i32, %c0_i32_0 : i32, i32
  }
  func.func @transform_9(%arg0: i32) -> (i32, i32, i32) {
    %c0_i32 = arith.constant 0 : i32
    %c0_i32_0 = arith.constant 0 : i32
    %c0_i32_1 = arith.constant 0 : i32
    %c0_i32_2 = arith.constant 0 : i32
    return %c0_i32, %c0_i32_0, %c0_i32_1 : i32, i32, i32
  }
  func.func @transform_10(%arg0: i32) -> (i32, i32, i32) {
    %c0_i32 = arith.constant 0 : i32
    %c0_i32_0 = arith.constant 0 : i32
    %c0_i32_1 = arith.constant 0 : i32
    %c0_i32_2 = arith.constant 0 : i32
    return %c0_i32, %c0_i32_0, %c0_i32_1 : i32, i32, i32
  }
  func.func @transform_11(%arg0: i32) -> (i32, i32) {
    %c0_i32 = arith.constant 0 : i32
    %c0_i32_0 = arith.constant 0 : i32
    return %arg0, %c0_i32 : i32, i32
  }
  func.func @transform_12(%arg0: i32) -> (i32, i32, i32) {
    %c0_i32 = arith.constant 0 : i32
    %c0_i32_0 = arith.constant 0 : i32
    %c0_i32_1 = arith.constant 0 : i32
    %c0_i32_2 = arith.constant 0 : i32
    return %c0_i32, %c0_i32_0, %c0_i32_1 : i32, i32, i32
  }
  func.func @transform_13(%arg0: i32) -> (i32, i32, i32) {
    %c0_i32 = arith.constant 0 : i32
    %c0_i32_0 = arith.constant 0 : i32
    %c0_i32_1 = arith.constant 0 : i32
    %c0_i32_2 = arith.constant 0 : i32
    return %c0_i32, %c0_i32_0, %c0_i32_1 : i32, i32, i32
  }
}

</mosaic_0001>

<bundles_post_ra>
// kernel: rnn_forward.1
= control target key start
LH: loop header
LB: loop body
LE: loop exit
PB: predicated region body
PF: predicated region fallthrough
CT: control target
= control target key end

     0   :  { %s2064_s25 = smov 0   ;;  %s2369_s0 = inlined_call_operand.vmem [shape: f32[64,128], index: 0, kind: input, shape index: {}]   ;;  %s2370_s1 = inlined_call_operand.vmem [shape: bf16[128,128], index: 1, kind: input, shape index: {}]   ;;  %s2371_s2 = inlined_call_operand.vmem [shape: bf16[32,128], index: 2, kind: input, shape index: {}]   ;;  %s2372_s3 = inlined_call_operand.vmem [shape: f32[1,128], index: 3, kind: input, shape index: {}]   ;;  %s2373_s4 = inlined_call_operand.vmem [shape: bf16[32,128], index: 4, kind: input, shape index: {}]   ;;  %s2374_s5 = inlined_call_operand.vmem [shape: bf16[32,128], index: 5, kind: input, shape index: {}]   ;;  %s2375_s6 = inlined_call_operand.vmem [shape: f32[1,128], index: 6, kind: input, shape index: {}]   ;;  %s2376_s7 = inlined_call_operand.vmem [shape: bf16[32,128], index: 7, kind: input, shape index: {}]   ;;  %s2377_s8 = inlined_call_operand.vmem [shape: f32[1,128], index: 8, kind: input, shape index: {}]   ;;  %s2378_s9 = inlined_call_operand.vmem [shape: f32[2,8,32], index: 9, kind: input, shape index: {}]   ;;  %s2379_s10 = inlined_call_operand.vmem [shape: f32[2,8,32], index: 10, kind: input, shape index: {}]   ;;  %s2380_s11 = inlined_call_operand.vmem [shape: f32[64,128], index: 11, kind: output, shape index: {0}]   ;;  %s2381_s12 = inlined_call_operand.vmem [shape: f32[2,8,32], index: 12, kind: output, shape index: {1}]   ;;  %s2382_s13 = inlined_call_operand.vmem [shape: f32[2,8,32], index: 13, kind: output, shape index: {2}]  }
   0x1 LB: > { %s1643_s26 = sadd.s32 4294967295, %s1987_s25   ;;  %p1647_p0 = scmp.ge.s32.totalorder %s1987_s25, 1  ;;  %s1987_s25 = sphi %s2064_s25, %s24_s25  }
   0x2   : > { %p383_p1 = scmp.lt.s32.totalorder %s1987_s25, 3 }
   0x4   : > { %p384_p2 = pnand %p1647_p0, %p383_p1 }
   0x5   : > { %s1648_s27 = sshll.u32 (!%p384_p2), %s1643_s26, 2  ;;  %p1652_p4 = scmp.ne.s32.totalorder (!%p384_p2), %s1643_s26, 0 }
   0x6   : > { %387 = sbr.rel (%p384_p2) target bundleno = 5806 (0x16ae), region = 64  ;;  %p428_p3 = scmp.lt.s32.totalorder (!%p384_p2), %s1648_s27, 7 }
   0xb   : > { %s2384_s27 = smov (!%p428_p3, %s1648_s27), 7  ;;  %443 = sbr.rel (%p1652_p4) target bundleno = 19 (0x13), region = 68 }
   0xc   : > { %s1649_s28 = sshll.u32 %s2384_s27, 3 }
   0xd   : > { %s2075_s14 = scalar_lea.vmem %s2369_s0, %s1649_s28  ;;  %s2080_s17 = scalar_lea.vmem %s2380_s11, %s1649_s28 }
  0x10   : > { %v444_v0 = vld [vmem:[%s2378_s9] sm:$0xff]  ;;  %vm446_vm0 = vcmask 261120   ;;  %v445_v1 = vld [vmem:[%s2378_s9 + $0x8] sm:$0xff] }
  0x11   : > { %v449_v2 = vld [vmem:[%s2379_s10] sm:$0xff]  ;;  %447 = vst.msk [vmem:[%s2381_s12] sm:$0xff] %vm446_vm0, %v444_v0  ;;  %448 = vst.msk [vmem:[%s2381_s12 + $0x8] sm:$0xff] %vm446_vm0, %v445_v1  ;;  %v450_v3 = vld [vmem:[%s2379_s10 + $0x8] sm:$0xff] }
  0x12   : > { %451 = vst.msk [vmem:[%s2382_s13] sm:$0xff] %vm446_vm0, %v449_v2  ;;  %452 = vst.msk [vmem:[%s2382_s13 + $0x8] sm:$0xff] %vm446_vm0, %v450_v3 }
  0x13 PF: > { %v1885_v4 = vld [vmem:[%s2370_s1 + $0x38] sm:$0xff]   ;;  %v1886_v5 = vld [vmem:[%s2370_s1 + $0x30] sm:$0xff]   ;;  %v1989_v6 = vmov 0.0   ;;  %vm1990_vm1 = vmmov 0   ;;  %v1887_v7 = vld [vmem:[%s2370_s1 + $0x28] sm:$0xff]   ;;  %vm603_vm2 = vcmask 261120  }
  0x14   : > { %1792 = vmatprep.subr.bf16.mxu1 %v1989_v6  ;;  %1772 = vmatprep.subr.bf16.mxu0 %v1885_v4  ;;  %v1891_v8 = vld [vmem:[%s2371_s2 + $0x8] sm:$0xff]   ;;  %v1888_v9 = vld [vmem:[%s2370_s1 + $0x20] sm:$0xff]   ;;  %v1889_v14 = vld [vmem:[%s2370_s1 + $0x18] sm:$0xff]   ;;  %s1992_s18 = smov 32   ;;  %vm683_vm3 = vcmask 257024  }
  0x15   : > { %1796 = vmatprep.mubr.msk.bf16.mxu1 %vm1990_vm1, %v1989_v6  ;;  %1773 = vmatpush3.bf16.msra.mxu0 %v1885_v4  ;;  %v1893_v10 = vld [vmem:[%s2371_s2] sm:$0xff]   ;;  %v454_v13 = vld [vmem:[%s2075_s14 + $0x8] sm:$0xff]  ;;  %v1890_v17 = vld [vmem:[%s2370_s1 + $0x10] sm:$0xff]  }
  0x16   : > { %1774 = vmatprep.subr.bf16.mxu0 %v1886_v5  ;;  %1793 = vmatpush3.bf16.msra.mxu1 %v1891_v8  ;;  %v453_v12 = vld [vmem:[%s2075_s14] sm:$0xff]  ;;  %v1892_v18 = vld [vmem:[%s2370_s1 + $0x8] sm:$0xff]   ;;  %v455_v20 = vld [vmem:[%s2075_s14 + $0x10] sm:$0xff] }
  0x17   : > { %1794 = vmatprep.subr.bf16.mxu1 %v1989_v6  ;;  %v457_v16 = vpack.c.bf16 %v454_v13, %v453_v12  ;;  %v1894_v19 = vld [vmem:[%s2370_s1] sm:$0xff]   ;;  %v456_v21 = vld [vmem:[%s2075_s14 + $0x18] sm:$0xff]  ;;  %s1991_s14 = smov 64   ;;  %v1895_v47 = vld [vmem:[%s2371_s2 + $0x8] sm:$0xff]  }
  0x18   : > { %v583_v11 = vld [vmem:[%s2381_s12] sm:$0xff]  ;;  %v458_v22 = vpack.c.bf16 %v456_v21, %v455_v20  ;;  %v1897_v8 = vld [vmem:[%s2371_s2 + $0x8] sm:$0xff]  }
  0x19   : > { %1775 = vmatpush3.bf16.msra.mxu0 %v1886_v5  ;;  %v586_v15 = vpack.c.bf16 %v583_v11, %v583_v11  ;;  %1788 = vmatprep.mubr.bf16.mxu0 %v457_v16  ;;  %v1653_v27 = vld [vmem:[%s2372_s3] ss:$0 sm:$0xff] }
  0x1a   : > { %1776 = vmatprep.subr.bf16.mxu0 %v1887_v7  ;;  %1795 = vmatpush3.bf16.msra.mxu1 %v1893_v10  ;;  %v584_v36 = vld [vmem:[%s2382_s13] sm:$0xff] }
  0x1b   : > { %1800 = vmatprep.subr.bf16.mxu1 %v1989_v6  ;;  %v1896_v48 = vld [vmem:[%s2371_s2] sm:$0xff]  }
  0x1d   : > { %1777 = vmatpush3.bf16.msra.mxu0 %v1887_v7  ;;  %1797 = vmatmul.mubr.msk.bf16.vlgmr.msra.gmra.mxu1 %vm603_vm2, %v586_v15 }
  0x1e   : > { %1778 = vmatprep.subr.bf16.mxu0 %v1888_v9  ;;  %1804 = vmatprep.mubr.msk.bf16.mxu1 %vm1990_vm1, %v1989_v6 }
  0x1f   : > { %1801 = vmatpush3.bf16.msra.mxu1 %v1895_v47 }
  0x20   : > { %1802 = vmatprep.subr.bf16.mxu1 %v1989_v6 }
  0x21   : > { %1779 = vmatpush3.bf16.msra.mxu0 %v1888_v9  ;;  %v1898_v9 = vld [vmem:[%s2371_s2] sm:$0xff]  }
  0x22   : > { %1780 = vmatprep.subr.bf16.mxu0 %v1889_v14 }
  0x23   : > { %1803 = vmatpush3.bf16.msra.mxu1 %v1896_v48 }
  0x24   : > { %1808 = vmatprep.subr.bf16.mxu1 %v1989_v6 }
  0x25   : > { %1781 = vmatpush3.bf16.msra.mxu0 %v1889_v14 }
  0x26   : > { %1782 = vmatprep.subr.bf16.mxu0 %v1890_v17 }
  0x29   : > { %1783 = vmatpush3.bf16.msra.mxu0 %v1890_v17 }
  0x2a   : > { %1784 = vmatprep.subr.bf16.mxu0 %v1892_v18 }
  0x2d   : > { %1785 = vmatpush3.bf16.msra.mxu0 %v1892_v18 }
  0x2e   : > { %1786 = vmatprep.subr.bf16.mxu0 %v1894_v19 }
  0x31   : > { %1787 = vmatpush3.bf16.msra.mxu0 %v1894_v19 }
  0x34   : > { %1789 = vmatmul.mubr.bf16.vlgmr.msra.gmra.mxu0 %v458_v22 }
  0xdd   : > { %v641_v23 = vpop.f32.mrf.mxu1 }
  0xdf   : > { %v1798_v24 = vpop.f32.mrf.mxu1 }
  0xe1   : > { %v644_v25 = vpop.f32.mrf.mxu1 }
  0xe3   : > { %v1799_v26 = vpop.f32.mrf.mxu1 }
  0xf4   : > { %v1790_v28 = vpop.f32.mrf.mxu0 }
  0xf5   : > { %v2154_v29 = vadd.f32 %v1790_v28, %v1653_v27 }
  0xf6   : > { %v564_v30 = vpop.f32.mrf.mxu0 }
  0xf7   : > { %v565_v31 = vadd.f32 %v1653_v27, %v564_v30  ;;  %v1899_v30 = vld [vmem:[%s2371_s2 + $0x8] sm:$0xff]  }
  0xf8   : > { %v1791_v32 = vpop.f32.mrf.mxu0 }
  0xf9   : > { %v647_v33 = vadd.f32 %v641_v23, %v565_v31  ;;  %v2156_v34 = vadd.f32 %v1791_v32, %v1653_v27  ;;  %v1900_v31 = vld [vmem:[%s2371_s2] sm:$0xff]  }
  0xfa   : > { %v567_v54 = vpop.f32.mrf.mxu0 }
  0xfb   : > { %1917 = vtanh.f32 %v647_v33  ;;  %v1665_v37 = vmul.f32 -1.442695, %v647_v33  ;;  %v568_v55 = vadd.f32 %v1653_v27, %v567_v54 }
  0xfd   : > { %1919 = vpow2.f32 %v1665_v37 }
 0x108   : > { %v1918_v35 = vpop.eup %1917 }
 0x109   : > { %661 = vrot.lane.b32.xlu0 %v1918_v35, %s1991_s14 }
 0x10a   : > { %v1920_v38 = vpop.eup %1919 }
 0x10b   : > { %v651_v39 = vadd.f32 1.0, %v1920_v38 }
 0x10d   : > { %656 = vrot.lane.b32.xlu0 %v584_v36, %s1992_s18  ;;  %1921 = vrcp.f32 %v651_v39 }
 0x11a   : > { %v1922_v40 = vpop.eup %1921 }
 0x17b   : > { %v662_v41 = vpop.permute.xlu0 %661 }
 0x17c   : > { %v664_v42 = vmul.f32 %v1922_v40, %v662_v41 }
 0x17e   : > { %666 = vrot.lane.b32.xlu1 %v664_v42, %s1992_s18 }
 0x17f   : > { %v657_v43 = vpop.permute.xlu0 %656 }
 0x180   : > { %v659_v44 = vmul.f32 %v1922_v40, %v657_v43 }
 0x1f0   : > { %v667_v45 = vpop.permute.xlu1 %666 }
 0x1f1   : > { %v669_v46 = vadd.f32 %v667_v45, %v659_v44 }
 0x1f3   : > { %1923 = vtanh.f32 %v669_v46 }
 0x200   : > { %v1924_v49 = vpop.eup %1923 }
 0x201   : > { %672 = vrot.lane.b32.xlu1 %v1924_v49, %s1991_s14 }
 0x273   : > { %v673_v50 = vpop.permute.xlu1 %672 }
 0x274   : > { %v675_v51 = vmul.f32 %v1922_v40, %v673_v50 }
 0x276   : > { %v2173_v52 = vpack.c.bf16 %v675_v51, %v675_v51 }
 0x278   : > { %691 = vrot.lane.b32.xlu0 %v2173_v52, %s1992_s18 }
 0x2ea   : > { %v692_v53 = vpop.permute.xlu0 %691 }
 0x2eb   : > { %1805 = vmatmul.mubr.msk.bf16.vlgmr.msra.gmra.mxu1 %vm603_vm2, %v692_v53 }
 0x2ec   : > { %1812 = vmatprep.mubr.msk.bf16.mxu1 %vm1990_vm1, %v1989_v6  ;;  %1809 = vmatpush3.bf16.msra.mxu1 %v1897_v8 }
 0x2ed   : > { %1810 = vmatprep.subr.bf16.mxu1 %v1989_v6 }
 0x2f0   : > { %1811 = vmatpush3.bf16.msra.mxu1 %v1898_v9 }
 0x2f1   : > { %1816 = vmatprep.subr.bf16.mxu1 %v1989_v6 }
 0x3ab   : > { %v742_v56 = vpop.f32.mrf.mxu1 }
 0x3ac   : > { %v748_v57 = vadd.f32 %v742_v56, %v568_v55  ;;  %v1902_v56 = vld [vmem:[%s2373_s4 + $0x8] sm:$0xff]  }
 0x3ad   : > { %v1806_v58 = vpop.f32.mrf.mxu1  ;;  %1824 = vmatprep.subr.bf16.mxu0 %v1902_v56 }
 0x3ae   : > { %1925 = vtanh.f32 %v748_v57  ;;  %v1670_v62 = vmul.f32 -1.442695, %v748_v57  ;;  %v1904_v57 = vld [vmem:[%s2373_s4] sm:$0xff]   ;;  %1825 = vmatpush3.bf16.msra.mxu0 %v1902_v56 }
 0x3af   : > { %v745_v59 = vpop.f32.mrf.mxu1  ;;  %v1905_v58 = vld [vmem:[%s2374_s5] sm:$0xff]   ;;  %1826 = vmatprep.subr.bf16.mxu0 %v1904_v57 }
 0x3b0   : > { %1927 = vpow2.f32 %v1670_v62  ;;  %v1689_v59 = vld [vmem:[%s2381_s12 + $0x8] sm:$0xff] }
 0x3b1   : > { %v1807_v60 = vpop.f32.mrf.mxu1 }
 0x3b2   : > { %v1087_v60 = vpack.c.bf16 %v1689_v59, %v1689_v59  ;;  %1827 = vmatpush3.bf16.msra.mxu0 %v1904_v57 }
 0x3b3   : > { %1840 = vmatprep.subr.bf16.mxu0 %v1989_v6 }
 0x3bb   : > { %v1926_v61 = vpop.eup %1925 }
 0x3bc   : > { %758 = vrot.lane.b32.xlu1 %v1926_v61, %s1991_s14 }
 0x3bd   : > { %v1928_v63 = vpop.eup %1927 }
 0x3be   : > { %v752_v0 = vadd.f32 1.0, %v1928_v63 }
 0x3c0   : > { %1929 = vrcp.f32 %v752_v0 }
 0x3cd   : > { %v1930_v1 = vpop.eup %1929 }
 0x3ce   : > { %v756_v4 = vmul.f32 %v1930_v1, %v669_v46 }
 0x42e   : > { %v759_v2 = vpop.permute.xlu1 %758 }
 0x42f   : > { %v761_v3 = vmul.f32 %v1930_v1, %v759_v2 }
 0x431   : > { %763 = vrot.lane.b32.xlu0 %v761_v3, %s1992_s18 }
 0x4a3   : > { %v764_v5 = vpop.permute.xlu0 %763 }
 0x4a4   : > { %v766_v7 = vadd.f32 %v764_v5, %v756_v4 }
 0x4a6   : > { %1931 = vtanh.f32 %v766_v7 }
 0x4b3   : > { %v1932_v10 = vpop.eup %1931 }
 0x4b4   : > { %769 = vrot.lane.b32.xlu1 %v1932_v10, %s1991_s14  ;;  %v1682_v10 = vld [vmem:[%s2375_s6] ss:$0 sm:$0xff] }
 0x526   : > { %v770_v11 = vpop.permute.xlu1 %769 }
 0x527   : > { %v772_v12 = vmul.f32 %v1930_v1, %v770_v11  ;;  %v1690_v1 = vld [vmem:[%s2382_s13 + $0x8] sm:$0xff] }
 0x529   : > { %v2191_v13 = vpack.c.bf16 %v772_v12, %v772_v12 }
 0x52b   : > { %788 = vrot.lane.b32.xlu0 %v2191_v13, %s1992_s18 }
 0x59d   : > { %v789_v14 = vpop.permute.xlu0 %788 }
 0x59e   : > { %1813 = vmatmul.mubr.msk.bf16.vlgmr.msra.gmra.mxu1 %vm603_vm2, %v789_v14 }
 0x59f   : > { %1820 = vmatprep.mubr.msk.bf16.mxu1 %vm1990_vm1, %v1989_v6  ;;  %1817 = vmatpush3.bf16.msra.mxu1 %v1899_v30  ;;  %v1908_v30 = vld [vmem:[%s2374_s5] sm:$0xff]  }
 0x5a0   : > { %1818 = vmatprep.subr.bf16.mxu1 %v1989_v6 }
 0x5a3   : > { %1819 = vmatpush3.bf16.msra.mxu1 %v1900_v31 }
 0x5a4   : > { %1832 = vmatprep.subr.bf16.mxu1 %v1989_v6 }
 0x65e   : > { %v839_v15 = vpop.f32.mrf.mxu1 }
 0x65f   : > { %v845_v16 = vadd.f32 %v839_v15, %v2154_v29 }
 0x660   : > { %v1814_v17 = vpop.f32.mrf.mxu1 }
 0x661   : > { %1933 = vtanh.f32 %v845_v16  ;;  %v1675_v21 = vmul.f32 -1.442695, %v845_v16 }
 0x662   : > { %v842_v18 = vpop.f32.mrf.mxu1 }
 0x663   : > { %1935 = vpow2.f32 %v1675_v21 }
 0x664   : > { %v1815_v19 = vpop.f32.mrf.mxu1 }
 0x66e   : > { %v1934_v20 = vpop.eup %1933 }
 0x66f   : > { %855 = vrot.lane.b32.xlu1 %v1934_v20, %s1991_s14 }
 0x670   : > { %v1936_v22 = vpop.eup %1935 }
 0x671   : > { %v849_v23 = vadd.f32 1.0, %v1936_v22 }
 0x673   : > { %1937 = vrcp.f32 %v849_v23 }
 0x680   : > { %v1938_v24 = vpop.eup %1937 }
 0x681   : > { %v853_v27 = vmul.f32 %v1938_v24, %v766_v7 }
 0x6e1   : > { %v856_v25 = vpop.permute.xlu1 %855 }
 0x6e2   : > { %v858_v26 = vmul.f32 %v1938_v24, %v856_v25 }
 0x6e4   : > { %860 = vrot.lane.b32.xlu0 %v858_v26, %s1992_s18 }
 0x756   : > { %v861_v28 = vpop.permute.xlu0 %860 }
 0x757   : > { %v863_v29 = vadd.f32 %v861_v28, %v853_v27 }
 0x759   : > { %1939 = vtanh.f32 %v863_v29 }
 0x766   : > { %v1940_v32 = vpop.eup %1939 }
 0x767   : > { %866 = vrot.lane.b32.xlu1 %v1940_v32, %s1991_s14 }
 0x7d9   : > { %v867_v33 = vpop.permute.xlu1 %866 }
 0x7da   : > { %v869_v35 = vmul.f32 %v1938_v24, %v867_v33 }
 0x7dc   : > { %v870_v36 = vpack.c.bf16 %v869_v35, %v869_v35 }
 0x7de   : > { %885 = vrot.lane.b32.xlu0 %v870_v36, %s1992_s18 }
 0x850   : > { %v886_v37 = vpop.permute.xlu0 %885 }
 0x851   : > { %1821 = vmatmul.mubr.msk.bf16.vlgmr.msra.gmra.mxu1 %vm603_vm2, %v886_v37 }
 0x852   : > { %1836 = vmatprep.mubr.msk.bf16.mxu1 %vm1990_vm1, %v1989_v6 }
 0x911   : > { %v936_v38 = vpop.f32.mrf.mxu1 }
 0x912   : > { %v942_v39 = vadd.f32 %v936_v38, %v2156_v34 }
 0x913   : > { %v1822_v40 = vpop.f32.mrf.mxu1 }
 0x914   : > { %1941 = vtanh.f32 %v942_v39  ;;  %v1680_v44 = vmul.f32 -1.442695, %v942_v39 }
 0x915   : > { %v939_v41 = vpop.f32.mrf.mxu1 }
 0x916   : > { %1943 = vpow2.f32 %v1680_v44 }
 0x917   : > { %v1823_v42 = vpop.f32.mrf.mxu1 }
 0x921   : > { %v1942_v43 = vpop.eup %1941 }
 0x922   : > { %952 = vrot.lane.b32.xlu1 %v1942_v43, %s1991_s14 }
 0x923   : > { %v1944_v45 = vpop.eup %1943 }
 0x924   : > { %v946_v46 = vadd.f32 1.0, %v1944_v45 }
 0x926   : > { %1945 = vrcp.f32 %v946_v46 }
 0x933   : > { %v1946_v47 = vpop.eup %1945 }
 0x934   : > { %v950_v34 = vmul.f32 %v1946_v47, %v863_v29  ;;  %v1907_v29 = vld [vmem:[%s2374_s5 + $0x8] sm:$0xff]  }
 0x994   : > { %v953_v48 = vpop.permute.xlu1 %952 }
 0x995   : > { %v955_v49 = vmul.f32 %v1946_v47, %v953_v48 }
 0x997   : > { %957 = vrot.lane.b32.xlu0 %v955_v49, %s1992_s18 }
 0x99b   : > { %680 = vrot.lane.b32.xlu0 %v2173_v52, %s1992_s18  ;;  %v1903_v52 = vld [vmem:[%s2374_s5 + $0x8] sm:$0xff]  }
 0x99c   : > { %1833 = vmatpush3.bf16.msra.mxu1 %v1903_v52  ;;  %v1910_v52 = vld [vmem:[%s2374_s5] sm:$0xff]  }
 0x99d   : > { %1834 = vmatprep.subr.bf16.mxu1 %v1989_v6 }
 0x99f   : > { %874 = vrot.lane.b32.xlu0 %v870_v36, %s1992_s18 }
 0x9a0   : > { %1835 = vmatpush3.bf16.msra.mxu1 %v1905_v58 }
 0x9a1   : > { %1848 = vmatprep.subr.bf16.mxu1 %v1989_v6 }
 0x9a3   : > { %1837 = vmatmul.mubr.msk.bf16.vlgmr.msra.gmra.mxu1 %vm603_vm2, %v1087_v60 }
 0x9a4   : > { %1852 = vmatprep.mubr.msk.bf16.mxu1 %vm1990_vm1, %v1989_v6 }
 0xa09   : > { %v958_v50 = vpop.permute.xlu0 %957 }
 0xa0a   : > { %v2220_v51 = vadd.f32 %v958_v50, %v950_v34 }
 0xa0c   : > { %1947 = vtanh.f32 %v2220_v51 }
 0xa0d   : > { %v681_v53 = vpop.permute.xlu0 %680 }
 0xa0e   : > { %684 = vst.msk [vmem:[#allocation3] sm:$0xf] %vm683_vm3, %v681_v53 }
 0xa11   : > { %v875_v54 = vpop.permute.xlu0 %874 }
 0xa12   : > { %878 = vst.msk [vmem:[#allocation3 + $0x8] sm:$0xf] %vm683_vm3, %v875_v54 }
 0xa19   : > { %v1948_v55 = vpop.eup %1947 }
 0xa1a   : > { %963 = vrot.lane.b32.xlu1 %v1948_v55, %s1991_s14  ;;  %v1909_v55 = vld [vmem:[%s2374_s5 + $0x8] sm:$0xff]  }
 0xa1b   : > { %1849 = vmatpush3.bf16.msra.mxu1 %v1909_v55 }
 0xa1c   : > { %1850 = vmatprep.subr.bf16.mxu1 %v1989_v6 }
 0xa1e   : > { %777 = vrot.lane.b32.xlu1 %v2191_v13, %s1992_s18 }
 0xa1f   : > { %1851 = vmatpush3.bf16.msra.mxu1 %v1910_v52 }
 0xa63   : > { %v1141_v5 = vpop.f32.mrf.mxu1 }
 0xa65   : > { %v1838_v7 = vpop.f32.mrf.mxu1 }
 0xa67   : > { %v1144_v8 = vpop.f32.mrf.mxu1 }
 0xa69   : > { %v1839_v9 = vpop.f32.mrf.mxu1 }
 0xa8c   : > { %v964_v61 = vpop.permute.xlu1 %963 }
 0xa8d   : > { %v2249_v62 = vmul.f32 %v1946_v47, %v964_v61 }
 0xa8f   : > { %v1725_v63 = vpack.c.bf16 %v2249_v62, %v2249_v62 }
 0xa90   : > { %v778_v0 = vpop.permute.xlu1 %777 }
 0xa91   : > { %781 = vst.msk [vmem:[#allocation3 + $0x4] sm:$0xf] %vm683_vm3, %v778_v0  ;;  %971 = vrot.lane.b32.xlu1 %v1725_v63, %s1992_s18 }
 0xa95   : > { %1156 = vrot.lane.b32.xlu1 %v1690_v1, %s1992_s18 }
 0xa98   : > { %v1901_v2 = vld [vmem:[#allocation3] sm:$0xff]  }
 0xa99   : > { %1828 = vmatprep.mubr.msk.bf16.mxu0 %vm603_vm2, %v1901_v2 }
 0xb03   : > { %v972_v3 = vpop.permute.xlu1 %971 }
 0xb04   : > { %975 = vst.msk [vmem:[#allocation3 + $0xc] sm:$0xf] %vm683_vm3, %v972_v3 }
 0xb07   : > { %v1157_v25 = vpop.permute.xlu1 %1156 }
 0xb0b   : > { %v1906_v4 = vld [vmem:[#allocation3 + $0x8] sm:$0xff]  }
 0xb0c   : > { %1829 = vmatmul.mubr.msk.bf16.vlgmr.msra.gmra.mxu0 %vm603_vm2, %v1906_v4 }
 0xb0d   : > { %1844 = vmatprep.mubr.msk.bf16.mxu0 %vm1990_vm1, %v1989_v6  ;;  %1841 = vmatpush3.bf16.msra.mxu0 %v1907_v29 }
 0xb0e   : > { %1842 = vmatprep.subr.bf16.mxu0 %v1989_v6 }
 0xb11   : > { %1843 = vmatpush3.bf16.msra.mxu0 %v1908_v30 }
 0xb12   : > { %1856 = vmatprep.subr.bf16.mxu0 %v1989_v6 }
 0xbcc   : > { %v1830_v11 = vpop.f32.mrf.mxu0 }
 0xbcd   : > { %v2267_v12 = vadd.f32 %v1830_v11, %v1682_v10 }
 0xbce   : > { %v1063_v13 = vpop.f32.mrf.mxu0 }
 0xbcf   : > { %v1064_v14 = vadd.f32 %v1682_v10, %v1063_v13 }
 0xbd0   : > { %v1831_v15 = vpop.f32.mrf.mxu0 }
 0xbd1   : > { %v1147_v16 = vadd.f32 %v1141_v5, %v1064_v14  ;;  %v2269_v17 = vadd.f32 %v1831_v15, %v1682_v10  ;;  %v1911_v14 = vld [vmem:[%s2374_s5 + $0x8] sm:$0xff]   ;;  %v1912_v15 = vld [vmem:[%s2374_s5] sm:$0xff]  }
 0xbd2   : > { %v1066_v37 = vpop.f32.mrf.mxu0 }
 0xbd3   : > { %1949 = vtanh.f32 %v1147_v16  ;;  %v1694_v19 = vmul.f32 -1.442695, %v1147_v16  ;;  %v1067_v38 = vadd.f32 %v1682_v10, %v1066_v37 }
 0xbd5   : > { %1951 = vpow2.f32 %v1694_v19 }
 0xbe0   : > { %v1950_v18 = vpop.eup %1949 }
 0xbe1   : > { %1161 = vrot.lane.b32.xlu0 %v1950_v18, %s1991_s14 }
 0xbe2   : > { %v1952_v20 = vpop.eup %1951 }
 0xbe3   : > { %v1151_v21 = vadd.f32 1.0, %v1952_v20 }
 0xbe5   : > { %1953 = vrcp.f32 %v1151_v21 }
 0xbf2   : > { %v1954_v22 = vpop.eup %1953 }
 0xbf3   : > { %v1159_v26 = vmul.f32 %v1954_v22, %v1157_v25 }
 0xc53   : > { %v1162_v23 = vpop.permute.xlu0 %1161 }
 0xc54   : > { %v1164_v24 = vmul.f32 %v1954_v22, %v1162_v23 }
 0xc56   : > { %1166 = vrot.lane.b32.xlu0 %v1164_v24, %s1992_s18 }
 0xcc8   : > { %v1167_v27 = vpop.permute.xlu0 %1166 }
 0xcc9   : > { %v1169_v28 = vadd.f32 %v1167_v27, %v1159_v26 }
 0xccb   : > { %1955 = vtanh.f32 %v1169_v28 }
 0xcd8   : > { %v1956_v31 = vpop.eup %1955 }
 0xcd9   : > { %1172 = vrot.lane.b32.xlu1 %v1956_v31, %s1991_s14 }
 0xd4b   : > { %v1173_v32 = vpop.permute.xlu1 %1172 }
 0xd4c   : > { %v1175_v33 = vmul.f32 %v1954_v22, %v1173_v32 }
 0xd4e   : > { %v2282_v35 = vpack.c.bf16 %v1175_v33, %v1175_v33 }
 0xd50   : > { %1189 = vrot.lane.b32.xlu0 %v2282_v35, %s1992_s18 }
 0xdc2   : > { %v1190_v36 = vpop.permute.xlu0 %1189 }
 0xdc3   : > { %1845 = vmatmul.mubr.msk.bf16.vlgmr.msra.gmra.mxu0 %vm603_vm2, %v1190_v36 }
 0xdc4   : > { %1860 = vmatprep.mubr.msk.bf16.mxu0 %vm1990_vm1, %v1989_v6  ;;  %1857 = vmatpush3.bf16.msra.mxu0 %v1911_v14 }
 0xdc5   : > { %1858 = vmatprep.subr.bf16.mxu0 %v1989_v6 }
 0xdc8   : > { %1859 = vmatpush3.bf16.msra.mxu0 %v1912_v15 }
 0xe83   : > { %v1240_v39 = vpop.f32.mrf.mxu0 }
 0xe84   : > { %v1246_v40 = vadd.f32 %v1240_v39, %v1067_v38 }
 0xe85   : > { %v1846_v41 = vpop.f32.mrf.mxu0 }
 0xe86   : > { %1957 = vtanh.f32 %v1246_v40  ;;  %v1699_v45 = vmul.f32 -1.442695, %v1246_v40  ;;  %v1915_v40 = vld [vmem:[%s2376_s7] sm:$0xff]  }
 0xe87   : > { %v1243_v42 = vpop.f32.mrf.mxu0 }
 0xe88   : > { %1959 = vpow2.f32 %v1699_v45 }
 0xe89   : > { %v1847_v43 = vpop.f32.mrf.mxu0 }
 0xe93   : > { %v1958_v44 = vpop.eup %1957 }
 0xe94   : > { %1256 = vrot.lane.b32.xlu1 %v1958_v44, %s1991_s14 }
 0xe95   : > { %v1960_v46 = vpop.eup %1959 }
 0xe96   : > { %v1250_v47 = vadd.f32 1.0, %v1960_v46 }
 0xe98   : > { %1961 = vrcp.f32 %v1250_v47 }
 0xea5   : > { %v1962_v48 = vpop.eup %1961 }
 0xea6   : > { %v1254_v50 = vmul.f32 %v1962_v48, %v1169_v28 }
 0xf06   : > { %v1257_v49 = vpop.permute.xlu1 %1256 }
 0xf07   : > { %v1259_v34 = vmul.f32 %v1962_v48, %v1257_v49 }
 0xf09   : > { %1261 = vrot.lane.b32.xlu0 %v1259_v34, %s1992_s18 }
 0xf7b   : > { %v1262_v53 = vpop.permute.xlu0 %1261 }
 0xf7c   : > { %v1264_v54 = vadd.f32 %v1262_v53, %v1254_v50  ;;  %v1713_v50 = vld [vmem:[%s2377_s8] ss:$0 sm:$0xff] }
 0xf7e   : > { %1963 = vtanh.f32 %v1264_v54 }
 0xf8b   : > { %v1964_v56 = vpop.eup %1963 }
 0xf8c   : > { %1267 = vrot.lane.b32.xlu1 %v1964_v56, %s1991_s14 }
 0xffe   : > { %v1268_v57 = vpop.permute.xlu1 %1267 }
 0xfff   : > { %v1270_v58 = vmul.f32 %v1962_v48, %v1268_v57 }
0x1001   : > { %v2299_v59 = vpack.c.bf16 %v1270_v58, %v1270_v58 }
0x1003   : > { %1284 = vrot.lane.b32.xlu0 %v2299_v59, %s1992_s18 }
0x1075   : > { %v1285_v60 = vpop.permute.xlu0 %1284 }
0x1076   : > { %1853 = vmatmul.mubr.msk.bf16.vlgmr.msra.gmra.mxu1 %vm603_vm2, %v1285_v60 }
0x1136   : > { %v1335_v61 = vpop.f32.mrf.mxu1 }
0x1137   : > { %v1341_v63 = vadd.f32 %v1335_v61, %v2267_v12 }
0x1138   : > { %v1854_v0 = vpop.f32.mrf.mxu1 }
0x1139   : > { %1965 = vtanh.f32 %v1341_v63  ;;  %v1704_v4 = vmul.f32 -1.442695, %v1341_v63 }
0x113a   : > { %v1338_v1 = vpop.f32.mrf.mxu1 }
0x113b   : > { %1967 = vpow2.f32 %v1704_v4 }
0x113c   : > { %v1855_v2 = vpop.f32.mrf.mxu1 }
0x1146   : > { %v1966_v3 = vpop.eup %1965 }
0x1147   : > { %1351 = vrot.lane.b32.xlu1 %v1966_v3, %s1991_s14 }
0x1148   : > { %v1968_v5 = vpop.eup %1967 }
0x1149   : > { %v1345_v7 = vadd.f32 1.0, %v1968_v5 }
0x114b   : > { %1969 = vrcp.f32 %v1345_v7 }
0x1158   : > { %v1970_v8 = vpop.eup %1969 }
0x1159   : > { %v1349_v11 = vmul.f32 %v1970_v8, %v1264_v54 }
0x11b9   : > { %v1352_v9 = vpop.permute.xlu1 %1351 }
0x11ba   : > { %v1354_v10 = vmul.f32 %v1970_v8, %v1352_v9 }
0x11bc   : > { %1356 = vrot.lane.b32.xlu0 %v1354_v10, %s1992_s18 }
0x122e   : > { %v1357_v13 = vpop.permute.xlu0 %1356 }
0x122f   : > { %v1359_v12 = vadd.f32 %v1357_v13, %v1349_v11 }
0x1231   : > { %1971 = vtanh.f32 %v1359_v12 }
0x123e   : > { %v1972_v16 = vpop.eup %1971 }
0x123f   : > { %1362 = vrot.lane.b32.xlu1 %v1972_v16, %s1991_s14 }
0x12b1   : > { %v1363_v18 = vpop.permute.xlu1 %1362 }
0x12b2   : > { %v1365_v19 = vmul.f32 %v1970_v8, %v1363_v18 }
0x12b4   : > { %v1366_v20 = vpack.c.bf16 %v1365_v19, %v1365_v19 }
0x12b6   : > { %1379 = vrot.lane.b32.xlu0 %v1366_v20, %s1992_s18 }
0x1328   : > { %v1380_v21 = vpop.permute.xlu0 %1379 }
0x1329   : > { %1861 = vmatmul.mubr.msk.bf16.vlgmr.msra.gmra.mxu0 %vm603_vm2, %v1380_v21 }
0x13e9   : > { %v1430_v22 = vpop.f32.mrf.mxu0 }
0x13ea   : > { %v1436_v23 = vadd.f32 %v1430_v22, %v2269_v17 }
0x13eb   : > { %v1862_v24 = vpop.f32.mrf.mxu0 }
0x13ec   : > { %1973 = vtanh.f32 %v1436_v23  ;;  %v1709_v27 = vmul.f32 -1.442695, %v1436_v23 }
0x13ed   : > { %v1433_v25 = vpop.f32.mrf.mxu0 }
0x13ee   : > { %1975 = vpow2.f32 %v1709_v27 }
0x13ef   : > { %v1863_v26 = vpop.f32.mrf.mxu0 }
0x13f9   : > { %v1974_v6 = vpop.eup %1973 }
0x13fa   : > { %1446 = vrot.lane.b32.xlu1 %v1974_v6, %s1991_s14 }
0x13fb   : > { %v1976_v28 = vpop.eup %1975 }
0x13fc   : > { %v1440_v29 = vadd.f32 1.0, %v1976_v28 }
0x13fe   : > { %1977 = vrcp.f32 %v1440_v29 }
0x140b   : > { %v1978_v30 = vpop.eup %1977 }
0x140c   : > { %v1444_v17 = vmul.f32 %v1978_v30, %v1359_v12 }
0x146c   : > { %v1447_v31 = vpop.permute.xlu1 %1446 }
0x146d   : > { %v1449_v32 = vmul.f32 %v1978_v30, %v1447_v31 }
0x146f   : > { %1451 = vrot.lane.b32.xlu0 %v1449_v32, %s1992_s18 }
0x1473   : > { %1180 = vrot.lane.b32.xlu0 %v2282_v35, %s1992_s18 }
0x1477   : > { %1370 = vrot.lane.b32.xlu0 %v1366_v20, %s1992_s18 }
0x147b   : > { %977 = vrot.lane.b32.xlu0 %v2249_v62, %s1992_s18  ;;  %v1914_v62 = vld [vmem:[%s2376_s7 + $0x8] sm:$0xff]  }
0x147c   : > { %1864 = vmatprep.subr.bf16.mxu1 %v1914_v62 }
0x147d   : > { %1865 = vmatpush3.bf16.msra.mxu1 %v1914_v62 }
0x147e   : > { %1866 = vmatprep.subr.bf16.mxu1 %v1915_v40 }
0x1481   : > { %1867 = vmatpush3.bf16.msra.mxu1 %v1915_v40 }
0x14e1   : > { %v1452_v33 = vpop.permute.xlu0 %1451 }
0x14e2   : > { %v1454_v36 = vadd.f32 %v1452_v33, %v1444_v17 }
0x14e4   : > { %1979 = vtanh.f32 %v1454_v36 }
0x14e5   : > { %v1181_v37 = vpop.permute.xlu0 %1180 }
0x14e6   : > { %1183 = vst.msk [vmem:[#allocation3] sm:$0xf] %vm683_vm3, %v1181_v37 }
0x14e9   : > { %v1371_v38 = vpop.permute.xlu0 %1370 }
0x14ea   : > { %1373 = vst.msk [vmem:[#allocation3 + $0x8] sm:$0xf] %vm683_vm3, %v1371_v38 }
0x14ed   : > { %v978_v39 = vpop.permute.xlu0 %977 }
0x14ee   : > { %980 = vst.msk [vmem:[%s2381_s12] sm:$0xff] %vm603_vm2, %v978_v39 }
0x14f1   : > { %v1980_v35 = vpop.eup %1979 }
0x14f2   : > { %1457 = vrot.lane.b32.xlu1 %v1980_v35, %s1991_s14  ;;  %s1993_s14 = smov 96  }
0x14f6   : > { %1275 = vrot.lane.b32.xlu1 %v2299_v59, %s1992_s18 }
0x1564   : > { %v1458_v41 = vpop.permute.xlu1 %1457 }
0x1565   : > { %v1460_v42 = vmul.f32 %v1978_v30, %v1458_v41 }
0x1567   : > { %v1729_v43 = vpack.c.bf16 %v1460_v42, %v1460_v42  ;;  %1470 = vrot.lane.b32.xlu0 %v1460_v42, %s1992_s18 }
0x1568   : > { %v1276_v44 = vpop.permute.xlu1 %1275 }
0x1569   : > { %1278 = vst.msk [vmem:[#allocation3 + $0x4] sm:$0xf] %vm683_vm3, %v1276_v44  ;;  %1465 = vrot.lane.b32.xlu1 %v1729_v43, %s1992_s18 }
0x156d   : > { %982 = vrot.lane.b32.xlu1 %v2220_v51, %s1993_s14 }
0x1570   : > { %v1913_v45 = vld [vmem:[#allocation3] sm:$0xff]  }
0x1571   : > { %1475 = vrot.lane.b32.xlu1 %v1454_v36, %s1993_s14  ;;  %1868 = vmatprep.mubr.msk.bf16.mxu1 %vm603_vm2, %v1913_v45 }
0x15d9   : > { %v1471_v46 = vpop.permute.xlu0 %1470 }
0x15da   : > { %1711 = vst.msk [vmem:[%s2381_s12 + $0x8] sm:$0xff] %vm603_vm2, %v1471_v46 }
0x15db   : > { %v1466_v47 = vpop.permute.xlu1 %1465 }
0x15dc   : > { %1468 = vst.msk [vmem:[#allocation3 + $0xc] sm:$0xf] %vm683_vm3, %v1466_v47 }
0x15df   : > { %v983_v48 = vpop.permute.xlu1 %982 }
0x15e0   : > { %985 = vst.msk [vmem:[%s2382_s13] sm:$0xff] %vm603_vm2, %v983_v48 }
0x15e3   : > { %v1476_v51 = vpop.permute.xlu1 %1475  ;;  %v1916_v49 = vld [vmem:[#allocation3 + $0x8] sm:$0xff]  }
0x15e4   : > { %1712 = vst.msk [vmem:[%s2382_s13 + $0x8] sm:$0xff] %vm603_vm2, %v1476_v51  ;;  %1869 = vmatmul.mubr.msk.bf16.vlgmr.msra.gmra.mxu1 %vm603_vm2, %v1916_v49 }
0x16a4   : > { %v1870_v34 = vpop.f32.mrf.mxu1 }
0x16a5   : > { %v1565_v57 = vadd.f32 %v1870_v34, %v1713_v50 }
0x16a6   : > { %v1556_v53 = vpop.f32.mrf.mxu1 }
0x16a7   : > { %v1557_v54 = vadd.f32 %v1713_v50, %v1556_v53  ;;  %1573 = vst [vmem:[%s2080_s17 + $0x10] sm:$0xff] %v1565_v57 }
0x16a8   : > { %v1871_v55 = vpop.f32.mrf.mxu1 }
0x16a9   : > { %1571 = vst [vmem:[%s2080_s17] sm:$0xff] %v1557_v54  ;;  %v1568_v58 = vadd.f32 %v1871_v55, %v1713_v50 }
0x16aa   : > { %v1559_v52 = vpop.f32.mrf.mxu1 }
0x16ab   : > { %v1560_v56 = vadd.f32 %v1713_v50, %v1559_v52  ;;  %1574 = vst [vmem:[%s2080_s17 + $0x18] sm:$0xff] %v1568_v58 }
0x16ad   : > { %1572 = vst [vmem:[%s2080_s17 + $0x8] sm:$0xff] %v1560_v56 }
0x16ae PF: > { %s24_s25 = sadd.s32 1, %s1987_s25  }
0x16af   : > { %p21_p5 = scmp.ge.s32.totalorder %s24_s25, 4  }
0x16b1   :  { %23 = sbr.rel (!%p21_p5) target bundleno = 1 (0x1), region = 122 }

</bundles_post_ra>
